<compile_context>
chip_gen: v6e
topology: v6e:2x2x1
jax: 0.10.0
libtpu: 0.0.40
codegen_flags: <defaults>
</compile_context>

<pallas_src>
import functools

import jax
import jax.numpy as jnp
from jax.experimental import pallas as pl
from jax.experimental.pallas import tpu as pltpu

LANE = 128


def _round_up(x, m):
    return ((x + m - 1) // m) * m


def _pad2(a, rows, cols):
    return jnp.zeros((rows, cols), a.dtype).at[: a.shape[0], : a.shape[1]].set(a)


@functools.lru_cache(maxsize=None)
def _select_config():
    """Generation-aware tile sizes / VMEM limit (conservative fallback)."""
    try:
        vmem_phys = int(getattr(pltpu.get_tpu_info(), "vmem_capacity_bytes", 0))
    except Exception:
        vmem_phys = 0
    if vmem_phys >= 100 * 1024 * 1024:          # v5e / v6e: 128 MiB VMEM
        return dict(tm=256, tk_max=512, vmem_limit=96 * 1024 * 1024)
    # v7x (64 MiB physical) or unknown backend: conservative settings.
    return dict(tm=128, tk_max=512, vmem_limit=40 * 1024 * 1024)


def _pick_tk(n_pad, tm, tk_max):
    """Largest multiple of tm that divides n_pad and is <= tk_max."""
    tk = tm
    while tk * 2 <= tk_max and n_pad % (tk * 2) == 0:
        tk *= 2
    return tk


def _const_spec(shape):
    """BlockSpec for a grid-invariant operand; single-buffered when supported."""
    index_map = lambda *_: (0,) * len(shape)
    try:
        return pl.BlockSpec(shape, index_map, pipeline_mode=pl.Buffered(1))
    except Exception:  # older jax without pipeline_mode / pl.Buffered
        return pl.BlockSpec(shape, index_map)


# -----------------------------------------------------------------------------
# Kernel 0: per-layer HW precompute.  HWs[tile] = dinv[tile] * (H[tile] @ W)
# (source-side half of the symmetric GCN normalization), stored in bf16.
# -----------------------------------------------------------------------------
def _hw_kernel(h_ref, w_ref, dinv_ref, out_ref):
    hw = jnp.dot(h_ref[...], w_ref[...], preferred_element_type=jnp.float32)
    out_ref[...] = (dinv_ref[...] * hw).astype(out_ref.dtype)


def _hw_call(h_bf, w_bf, dinv, *, tm, vmem_limit):
    n_pad, c_in = h_bf.shape
    c_out = w_bf.shape[1]
    return pl.pallas_call(
        _hw_kernel,
        out_shape=jax.ShapeDtypeStruct((n_pad, c_out), jnp.bfloat16),
        grid=(n_pad // tm,),
        in_specs=[
            pl.BlockSpec((tm, c_in), lambda i: (i, 0)),     # H row tile (bf16)
            _const_spec((c_in, c_out)),                     # W (bf16, invariant)
            pl.BlockSpec((tm, 1), lambda i: (i, 0)),        # dinv row tile (f32)
        ],
        out_specs=pl.BlockSpec((tm, c_out), lambda i: (i, 0)),
        compiler_params=pltpu.CompilerParams(
            dimension_semantics=("parallel",), vmem_limit_bytes=vmem_limit),
        cost_estimate=pl.CostEstimate(
            flops=2 * n_pad * c_in * c_out, transcendentals=0,
            bytes_accessed=2 * n_pad * (c_in + c_out) + 2 * c_in * c_out
            + 4 * n_pad),
    )(h_bf, w_bf, dinv)


# -----------------------------------------------------------------------------
# Kernel 1: K-tiled GCN aggregation for a row tile of destination nodes.
#   out[tile] = relu(dinv[tile] * (A01[tile, :] @ HWs) + b)  (+ H[tile] resid)
# -----------------------------------------------------------------------------
def _gcn_agg_kernel(a_ref, hws_ref, dinv_ref, b_ref, *rest, residual):
    if residual:
        h_ref, out_ref, acc_ref = rest
    else:
        out_ref, acc_ref = rest
    k = pl.program_id(1)

    @pl.when(k == 0)
    def _():
        acc_ref[...] = jnp.zeros_like(acc_ref)

    acc_ref[...] += jnp.dot(a_ref[...], hws_ref[...],
                            preferred_element_type=jnp.float32)

    @pl.when(k == pl.num_programs(1) - 1)
    def _():
        new = jnp.maximum(dinv_ref[...] * acc_ref[...] + b_ref[...], 0.0)
        if residual:
            new = h_ref[...].astype(jnp.float32) + new
        out_ref[...] = new.astype(out_ref.dtype)


def _gcn_layer_call(a01, hws, dinv, b, h_res, *, residual, tm, tk, vmem_limit):
    n_pad = a01.shape[0]
    c_out = hws.shape[1]
    grid = (n_pad // tm, n_pad // tk)
    operands = [a01, hws, dinv, b]
    in_specs = [
        pl.BlockSpec((tm, tk), lambda i, k: (i, k)),        # A row/col tile
        pl.BlockSpec((tk, c_out), lambda i, k: (k, 0)),     # HWs source tile
        pl.BlockSpec((tm, 1), lambda i, k: (i, 0)),         # dinv (dest side)
        _const_spec((1, c_out)),                            # bias
    ]
    if residual:
        operands.append(h_res)
        in_specs.append(pl.BlockSpec((tm, c_out), lambda i, k: (i, 0)))
    flops = 2 * n_pad * n_pad * c_out
    bytes_accessed = (2 * n_pad * n_pad                     # A (bf16, once)
                      + 2 * n_pad * c_out * grid[0]         # HWs per row tile
                      + 2 * n_pad * c_out                   # out (bf16)
                      + (2 * n_pad * c_out if residual else 0)
                      + 4 * n_pad + 4 * c_out)
    return pl.pallas_call(
        functools.partial(_gcn_agg_kernel, residual=residual),
        out_shape=jax.ShapeDtypeStruct((n_pad, c_out), jnp.bfloat16),
        grid=grid,
        in_specs=in_specs,
        out_specs=pl.BlockSpec((tm, c_out), lambda i, k: (i, 0)),
        scratch_shapes=[pltpu.VMEM((tm, c_out), jnp.float32)],
        compiler_params=pltpu.CompilerParams(
            dimension_semantics=("parallel", "arbitrary"),
            vmem_limit_bytes=vmem_limit),
        cost_estimate=pl.CostEstimate(
            flops=flops, transcendentals=0, bytes_accessed=bytes_accessed),
    )(*operands)


# -----------------------------------------------------------------------------
# Kernel 2: last GCN layer (residual) fused with attention gate + classifier.
# Weight layout avoids any lane slicing:
#   wf  = [wa1 | wc1 | 0]   (cols 0..half-1 attention, half..2half-1 classifier)
#   wa2 = row vector, zero outside attention lanes
#   wc2 = rows zero outside classifier lanes
# -----------------------------------------------------------------------------
def _gcn_head_kernel(a_ref, hws_ref, dinv_ref, b2_ref, h_ref, wf_ref, ba1_ref,
                     wa2_ref, ba2_ref, bc1_ref, wc2_ref, bc2_ref,
                     out_ref, acc_ref):
    k = pl.program_id(1)

    @pl.when(k == 0)
    def _():
        acc_ref[...] = jnp.zeros_like(acc_ref)

    acc_ref[...] += jnp.dot(a_ref[...], hws_ref[...],
                            preferred_element_type=jnp.float32)

    @pl.when(k == pl.num_programs(1) - 1)
    def _():
        agg = dinv_ref[...] * acc_ref[...] + b2_ref[...]
        h_fin = h_ref[...].astype(jnp.float32) + jnp.maximum(agg, 0.0)

        # Fused attention-L1 + classifier-L1: one MXU pass over [wa1 | wc1].
        fused = jnp.dot(h_fin.astype(jnp.bfloat16), wf_ref[...],
                        preferred_element_type=jnp.float32)

        # Attention logit: VPU multiply + lane reduction (wa2 row is zero
        # outside the attention lanes, so this equals a1 @ wa2).
        a1 = jnp.maximum(fused + ba1_ref[...], 0.0)
        att = jax.nn.sigmoid(
            jnp.sum(a1 * wa2_ref[...], axis=-1, keepdims=True) + ba2_ref[0])

        # (h*att) @ wc1 == att * (h @ wc1); wc2 rows are zero outside the
        # classifier lanes, so attention lanes of c1 contribute nothing.
        c1 = jnp.maximum(att * fused + bc1_ref[...], 0.0)
        out_ref[...] = (jnp.dot(c1.astype(jnp.bfloat16), wc2_ref[...],
                                preferred_element_type=jnp.float32)
                        + bc2_ref[...]).astype(out_ref.dtype)


def _gcn_head_call(a01, hws, dinv, h_res, p, *, tm, tk, vmem_limit):
    n_pad = a01.shape[0]
    hp = hws.shape[1]
    cp = p["wc2"].shape[1]
    grid = (n_pad // tm, n_pad // tk)
    flops = (2 * n_pad * n_pad * hp        # aggregation
             + 2 * n_pad * hp * hp         # fused attention/classifier L1
             + 2 * n_pad * hp * cp)        # classifier L2
    bytes_accessed = (2 * n_pad * n_pad + 2 * n_pad * hp * grid[0]
                      + 2 * n_pad * hp + 4 * n_pad * cp + 4 * n_pad
                      + 2 * hp * hp + 2 * hp * cp)
    return pl.pallas_call(
        _gcn_head_kernel,
        out_shape=jax.ShapeDtypeStruct((n_pad, cp), jnp.float32),
        grid=grid,
        in_specs=[
            pl.BlockSpec((tm, tk), lambda i, k: (i, k)),        # A tile
            pl.BlockSpec((tk, hp), lambda i, k: (k, 0)),        # HWs source tile
            pl.BlockSpec((tm, 1), lambda i, k: (i, 0)),         # dinv (dest)
            _const_spec((1, hp)),                               # b2
            pl.BlockSpec((tm, hp), lambda i, k: (i, 0)),        # residual H tile
            _const_spec((hp, hp)),                              # wf = [wa1|wc1]
            _const_spec((1, hp)),                               # ba1 (padded)
            _const_spec((1, hp)),                               # wa2 row (padded)
            pl.BlockSpec(memory_space=pltpu.MemorySpace.SMEM),  # ba2 scalar
            _const_spec((1, hp)),                               # bc1 (padded)
            _const_spec((hp, cp)),                              # wc2 (padded rows)
            _const_spec((1, cp)),                               # bc2 (padded)
        ],
        out_specs=pl.BlockSpec((tm, cp), lambda i, k: (i, 0)),
        scratch_shapes=[pltpu.VMEM((tm, hp), jnp.float32)],
        compiler_params=pltpu.CompilerParams(
            dimension_semantics=("parallel", "arbitrary"),
            vmem_limit_bytes=vmem_limit),
        cost_estimate=pl.CostEstimate(
            flops=flops, transcendentals=2 * n_pad,
            bytes_accessed=bytes_accessed),
    )(a01, hws, dinv, p["b2"], h_res, p["wf"], p["ba1"], p["wa2"], p["ba2"],
      p["bc1"], p["wc2"], p["bc2"])


# -----------------------------------------------------------------------------
# Glue: unnormalized adjacency (PyG add_remaining_self_loops) built directly at
# padded size, plus D^{-1/2}.  A stays exact 0/1(+multiplicity) in bf16; the
# normalization is applied in-kernel via dinv on both sides.
# -----------------------------------------------------------------------------
def build_adjacency(edge_index, num_nodes, n_pad):
    src, dst = edge_index[0], edge_index[1]
    adj = jnp.zeros((n_pad, n_pad), jnp.float32).at[dst, src].add(1.0)
    node = jnp.arange(n_pad)
    needs_loop = (node < num_nodes) & (adj[node, node] == 0.0)
    adj = adj.at[node, node].add(needs_loop.astype(jnp.float32))
    deg = adj.sum(axis=1)
    dinv = jnp.where(deg > 0.0, jax.lax.rsqrt(deg), 0.0)
    return adj.astype(jnp.bfloat16), dinv[:, None]


# -----------------------------------------------------------------------------
# Parameter prep: lane padding (->128), bf16 weights, attention/clf L1 fusion.
# -----------------------------------------------------------------------------
def prepare_params(params):
    node_dim, hidden = params["w0"].shape
    num_classes = params["wc2"].shape[1]
    half = hidden // 2
    fp = _round_up(node_dim, LANE)
    hp = _round_up(hidden, LANE)
    cp = _round_up(num_classes, LANE)
    bf = jnp.bfloat16

    wf = jnp.concatenate([params["wa1"], params["wc1"]], axis=1)   # [hidden, 2*half]
    wc2_full = jnp.zeros((hp, cp), jnp.float32)
    wc2_full = wc2_full.at[half:2 * half, :num_classes].set(params["wc2"])
    bc1_full = jnp.zeros((1, hp), jnp.float32).at[:, half:2 * half].set(params["bc1"])

    prepped = {
        "w0": _pad2(params["w0"], fp, hp).astype(bf),
        "b0": _pad2(params["b0"], 1, hp),
        "w1": _pad2(params["w1"], hp, hp).astype(bf),
        "b1": _pad2(params["b1"], 1, hp),
        "w2": _pad2(params["w2"], hp, hp).astype(bf),
        "b2": _pad2(params["b2"], 1, hp),
        "wf": _pad2(wf, hp, hp).astype(bf),
        "ba1": _pad2(params["ba1"], 1, hp),          # zero outside attention lanes
        "wa2": _pad2(params["wa2"].T, 1, hp),        # f32 row, used on the VPU
        "ba2": params["ba2"].reshape(1),             # SMEM scalar
        "bc1": bc1_full,                             # placed on classifier lanes
        "wc2": wc2_full.astype(bf),                  # rows zero outside clf lanes
        "bc2": _pad2(params["bc2"], 1, cp),
    }
    dims = dict(node_dim=node_dim, hidden=hidden, num_classes=num_classes,
                fp=fp, hp=hp, cp=cp)
    return prepped, dims


# -----------------------------------------------------------------------------
# Forward wrapper
# -----------------------------------------------------------------------------
def clutter_classification_gnn(x, edge_index, params, *, tm=None, tk=None):
    # TODO(synk): for genuinely sparse graphs at large N, replace the dense
    # A @ HWs aggregation with an edge-list gather path
    # (PrefetchScalarGridSpec + neighbor offsets) to avoid O(N^2) work.
    cfg = _select_config()
    tm = cfg["tm"] if tm is None else tm
    vmem_limit = cfg["vmem_limit"]

    n = x.shape[0]
    prepped, dims = prepare_params(params)
    n_pad = _round_up(n, max(tm, LANE))
    tk = _pick_tk(n_pad, tm, cfg["tk_max"]) if tk is None else tk

    a01, dinv = build_adjacency(edge_index, n, n_pad)
    x_bf = _pad2(x, n_pad, dims["fp"]).astype(jnp.bfloat16)

    layer = functools.partial(_gcn_layer_call, tm=tm, tk=tk,
                              vmem_limit=vmem_limit)
    hw = functools.partial(_hw_call, tm=tm, vmem_limit=vmem_limit)

    # Layer 0: h0 = relu(A_norm @ (x @ w0) + b0)
    hws = hw(x_bf, prepped["w0"], dinv)
    h = layer(a01, hws, dinv, prepped["b0"], None, residual=False)
    # Layer 1: h1 = h0 + relu(A_norm @ (h0 @ w1) + b1)
    hws = hw(h, prepped["w1"], dinv)
    h = layer(a01, hws, dinv, prepped["b1"], h, residual=True)
    # Layer 2 + attention gate + classifier head (fused):
    hws = hw(h, prepped["w2"], dinv)
    logits = _gcn_head_call(a01, hws, dinv, h, prepped,
                            tm=tm, tk=tk, vmem_limit=vmem_limit)
    # TODO(synk): nn.Dropout(0.2/0.3) are identity in eval mode; not applied.
    return logits[:n, :dims["num_classes"]]


# -----------------------------------------------------------------------------
# Pure-JAX f32 reference (for validation of the bf16 kernel path).
# -----------------------------------------------------------------------------
def reference_forward(x, edge_index, params):
    n = x.shape[0]
    adj01, dinv = build_adjacency(edge_index, n, n)
    a = dinv * adj01.astype(jnp.float32) * dinv[:, 0][None, :]

    def gcn(h, w, b):
        return jnp.maximum(a @ (h @ w) + b, 0.0)

    h = gcn(x, params["w0"], params["b0"])
    h = h + gcn(h, params["w1"], params["b1"])
    h = h + gcn(h, params["w2"], params["b2"])
    a1 = jnp.maximum(h @ params["wa1"] + params["ba1"], 0.0)
    att = jax.nn.sigmoid(a1 @ params["wa2"] + params["ba2"])
    hg = h * att
    c1 = jnp.maximum(hg @ params["wc1"] + params["bc1"], 0.0)
    return c1 @ params["wc2"] + params["bc2"]


# -----------------------------------------------------------------------------
# Deterministic synthetic parameters (matches module __init__ shapes).
# -----------------------------------------------------------------------------
def init_params(key, node_dim=32, hidden_dim=64, num_classes=2):
    ks = jax.random.split(key, 16)
    half = hidden_dim // 2

    def lin(k, fan_in, fan_out):
        return 0.1 * jax.random.normal(k, (fan_in, fan_out), jnp.float32)

    return {
        "w0": lin(ks[0], node_dim, hidden_dim),
        "b0": 0.01 * jax.random.normal(ks[1], (1, hidden_dim), jnp.float32),
        "w1": lin(ks[2], hidden_dim, hidden_dim),
        "b1": 0.01 * jax.random.normal(ks[3], (1, hidden_dim), jnp.float32),
        "w2": lin(ks[4], hidden_dim, hidden_dim),
        "b2": 0.01 * jax.random.normal(ks[5], (1, hidden_dim), jnp.float32),
        "wa1": lin(ks[6], hidden_dim, half),
        "ba1": 0.01 * jax.random.normal(ks[7], (1, half), jnp.float32),
        "wa2": lin(ks[8], half, 1),
        "ba2": 0.01 * jax.random.normal(ks[9], (1, 1), jnp.float32),
        "wc1": lin(ks[10], hidden_dim, half),
        "bc1": 0.01 * jax.random.normal(ks[11], (1, half), jnp.float32),
        "wc2": lin(ks[12], half, num_classes),
        "bc2": 0.01 * jax.random.normal(ks[13], (1, num_classes), jnp.float32),
    }


if __name__ == "__main__":
    key = jax.random.PRNGKey(0)
    k_x, k_e, k_p, k_x2, k_e2 = jax.random.split(key, 5)

    node_dim, hidden_dim, num_classes = 32, 64, 2
    params = init_params(k_p, node_dim=node_dim, hidden_dim=hidden_dim,
                         num_classes=num_classes)
    fwd = jax.jit(clutter_classification_gnn)

    def make_graph(kx, ke, num_nodes, num_edges):
        x = jax.random.normal(kx, (num_nodes, node_dim), jnp.float32)
        ring_src = jnp.arange(num_nodes, dtype=jnp.int32)
        ring_dst = (ring_src + 1) % num_nodes
        extra = jax.random.randint(ke, (2, num_edges - num_nodes), 0,
                                   num_nodes, jnp.int32)
        edge_index = jnp.concatenate(
            [jnp.stack([ring_src, ring_dst]), extra], axis=1)
        return x, edge_index

    # Small deterministic example (matches module __init__ defaults).
    x, edge_index = make_graph(k_x, k_e, num_nodes=16, num_edges=32)
    logits = fwd(x, edge_index, params)
    jax.block_until_ready(logits)
    assert logits.shape == (16, num_classes)
    ref = reference_forward(x, edge_index, params)
    err = float(jnp.max(jnp.abs(logits - ref)))
    assert err < 1e-1, err          # bf16 operands, f32 MXU accumulation

    # Larger randomized check (exercises padding, K-tiling and the bf16 path).
    x2, edge_index2 = make_graph(k_x2, k_e2, num_nodes=200, num_edges=800)
    logits2 = fwd(x2, edge_index2, params)
    jax.block_until_ready(logits2)
    ref2 = reference_forward(x2, edge_index2, params)
    err2 = float(jnp.max(jnp.abs(logits2 - ref2)))
    assert err2 < 1e-1, err2

    print("KERNEL_OK")
</pallas_src>

<mosaic_0001>
module attributes {stable_mosaic.version = 11 : i64} {
  func.func private @main(%arg0: i32) attributes {dimension_semantics = [#tpu.dimension_semantics<core_parallel>], iteration_bounds = array<i64: 2>, tpu.core_type = #tpu.core_type<sc_scalar_subcore>, window_params = []} {
    return
  }
}

module attributes {stable_mosaic.version = 11 : i64} {
  func.func private @main(%arg0: i32) attributes {dimension_semantics = [#tpu.dimension_semantics<core_parallel>], iteration_bounds = array<i64: 2>, tpu.core_type = #tpu.core_type<sc_scalar_subcore>, window_params = []} {
    return
  }
}

module attributes {stable_mosaic.version = 11 : i64} {
  func.func @_gcn_agg_kernel(%arg0: i32, %arg1: i32, %arg2: memref<128x128xbf16, #tpu.memory_space<vmem>>, %arg3: memref<128x128xbf16, #tpu.memory_space<vmem>>, %arg4: memref<128x1xf32, #tpu.memory_space<vmem>>, %arg5: memref<1x128xf32, #tpu.memory_space<vmem>>, %arg6: memref<128x128xbf16, #tpu.memory_space<vmem>>, %arg7: memref<128x128xf32, #tpu.memory_space<vmem>>) attributes {dimension_semantics = [#tpu.dimension_semantics<parallel>, #tpu.dimension_semantics<arbitrary>], iteration_bounds = array<i64: 1, 1>, scalar_prefetch = 0 : i64, scratch_operands = 1 : i64, tpu.core_type = #tpu.core_type<tc>, window_params = [{transform_indices = @transform_0, window_bounds = array<i64: 128, 128>}, {transform_indices = @transform_1, window_bounds = array<i64: 128, 128>}, {transform_indices = @transform_2, window_bounds = array<i64: 128, 1>}, {pipeline_mode = #tpu.pipeline_mode<synchronous>, transform_indices = @transform_3, window_bounds = array<i64: 1, 128>}, {transform_indices = @transform_4, window_bounds = array<i64: 128, 128>}]} {
    %c0_i32 = arith.constant 0 : i32
    %0 = arith.cmpi eq, %arg1, %c0_i32 : i32
    %1 = arith.extui %0 : i1 to i32
    %c0_i32_0 = arith.constant 0 : i32
    %2 = arith.cmpi ne, %1, %c0_i32_0 : i32
    scf.if %2 {
      %cst_10 = arith.constant 0.000000e+00 : f32
      %12 = vector.broadcast %cst_10 : f32 to vector<128x128xf32>
      %c0_11 = arith.constant 0 : index
      %c0_12 = arith.constant 0 : index
      %13 = vector.load %arg7[%c0_11, %c0_12] : memref<128x128xf32, #tpu.memory_space<vmem>>, vector<128x128xf32>
      tpu.vector_store %arg7[%c0_11, %c0_12], %12 {strides = array<i32>} : memref<128x128xf32, #tpu.memory_space<vmem>>, vector<128x128xf32>,
    } else {
    }
    %c0 = arith.constant 0 : index
    %c0_1 = arith.constant 0 : index
    %3 = vector.load %arg7[%c0, %c0_1] : memref<128x128xf32, #tpu.memory_space<vmem>>, vector<128x128xf32>
    %c0_2 = arith.constant 0 : index
    %c0_3 = arith.constant 0 : index
    %4 = vector.load %arg2[%c0_2, %c0_3] : memref<128x128xbf16, #tpu.memory_space<vmem>>, vector<128x128xbf16>
    %c0_4 = arith.constant 0 : index
    %c0_5 = arith.constant 0 : index
    %5 = vector.load %arg3[%c0_4, %c0_5] : memref<128x128xbf16, #tpu.memory_space<vmem>>, vector<128x128xbf16>
    %cst = arith.constant dense<0.000000e+00> : vector<128x128xf32>
    %6 = tpu.matmul %4, %5, %cst {dimension_numbers = #tpu.dot_dimension_numbers<[1], [0], [0], [1], [0, 0, 1, 1], [], []>} : vector<128x128xbf16>, vector<128x128xbf16>, vector<128x128xf32> -> vector<128x128xf32>
    %7 = arith.addf %3, %6 : vector<128x128xf32>
    %c0_6 = arith.constant 0 : index
    %c0_7 = arith.constant 0 : index
    %8 = vector.load %arg7[%c0_6, %c0_7] : memref<128x128xf32, #tpu.memory_space<vmem>>, vector<128x128xf32>
    tpu.vector_store %arg7[%c0_6, %c0_7], %7 {strides = array<i32>} : memref<128x128xf32, #tpu.memory_space<vmem>>, vector<128x128xf32>,
    %c0_i32_8 = arith.constant 0 : i32
    %9 = arith.cmpi eq, %arg1, %c0_i32_8 : i32
    %10 = arith.extui %9 : i1 to i32
    %c0_i32_9 = arith.constant 0 : i32
    %11 = arith.cmpi ne, %10, %c0_i32_9 : i32
    scf.if %11 {
      %c0_10 = arith.constant 0 : index
      %c0_11 = arith.constant 0 : index
      %12 = vector.load %arg4[%c0_10, %c0_11] : memref<128x1xf32, #tpu.memory_space<vmem>>, vector<128x1xf32>
      %c0_12 = arith.constant 0 : index
      %c0_13 = arith.constant 0 : index
      %13 = vector.load %arg7[%c0_12, %c0_13] : memref<128x128xf32, #tpu.memory_space<vmem>>, vector<128x128xf32>
      %14 = vector.broadcast %12 : vector<128x1xf32> to vector<128x128xf32>
      %15 = arith.mulf %14, %13 : vector<128x128xf32>
      %c0_14 = arith.constant 0 : index
      %c0_15 = arith.constant 0 : index
      %16 = vector.load %arg5[%c0_14, %c0_15] : memref<1x128xf32, #tpu.memory_space<vmem>>, vector<1x128xf32>
      %17 = vector.broadcast %16 : vector<1x128xf32> to vector<128x128xf32>
      %18 = arith.addf %15, %17 : vector<128x128xf32>
      %cst_16 = arith.constant 0.000000e+00 : f32
      %19 = vector.broadcast %cst_16 : f32 to vector<128x128xf32>
      %20 = arith.maximumf %18, %19 : vector<128x128xf32>
      %21 = arith.truncf %20 : vector<128x128xf32> to vector<128x128xbf16>
      %c0_17 = arith.constant 0 : index
      %c0_18 = arith.constant 0 : index
      %22 = vector.load %arg6[%c0_17, %c0_18] : memref<128x128xbf16, #tpu.memory_space<vmem>>, vector<128x128xbf16>
      tpu.vector_store %arg6[%c0_17, %c0_18], %21 {strides = array<i32>} : memref<128x128xbf16, #tpu.memory_space<vmem>>, vector<128x128xbf16>,
    } else {
    }
    return
  }
  func.func @transform_0(%arg0: i32, %arg1: i32) -> (i32, i32) {
    %c0_i32 = arith.constant 0 : i32
    return %arg0, %arg1 : i32, i32
  }
  func.func @transform_1(%arg0: i32, %arg1: i32) -> (i32, i32) {
    %c0_i32 = arith.constant 0 : i32
    %c0_i32_0 = arith.constant 0 : i32
    return %arg1, %c0_i32 : i32, i32
  }
  func.func @transform_2(%arg0: i32, %arg1: i32) -> (i32, i32) {
    %c0_i32 = arith.constant 0 : i32
    %c0_i32_0 = arith.constant 0 : i32
    return %arg0, %c0_i32 : i32, i32
  }
  func.func @transform_3(%arg0: i32, %arg1: i32) -> (i32, i32) {
    %c0_i32 = arith.constant 0 : i32
    %c0_i32_0 = arith.constant 0 : i32
    %c0_i32_1 = arith.constant 0 : i32
    return %c0_i32, %c0_i32_0 : i32, i32
  }
  func.func @transform_4(%arg0: i32, %arg1: i32) -> (i32, i32) {
    %c0_i32 = arith.constant 0 : i32
    %c0_i32_0 = arith.constant 0 : i32
    return %arg0, %c0_i32 : i32, i32
  }
}

module attributes {stable_mosaic.version = 11 : i64} {
  func.func @_hw_kernel(%arg0: i32, %arg1: memref<128x128xbf16, #tpu.memory_space<vmem>>, %arg2: memref<128x128xbf16, #tpu.memory_space<vmem>>, %arg3: memref<128x1xf32, #tpu.memory_space<vmem>>, %arg4: memref<128x128xbf16, #tpu.memory_space<vmem>>) attributes {dimension_semantics = [#tpu.dimension_semantics<parallel>], iteration_bounds = array<i64: 1>, scalar_prefetch = 0 : i64, scratch_operands = 0 : i64, tpu.core_type = #tpu.core_type<tc>, window_params = [{transform_indices = @transform_0, window_bounds = array<i64: 128, 128>}, {pipeline_mode = #tpu.pipeline_mode<synchronous>, transform_indices = @transform_1, window_bounds = array<i64: 128, 128>}, {transform_indices = @transform_2, window_bounds = array<i64: 128, 1>}, {transform_indices = @transform_3, window_bounds = array<i64: 128, 128>}]} {
    %c0 = arith.constant 0 : index
    %c0_0 = arith.constant 0 : index
    %0 = vector.load %arg1[%c0, %c0_0] : memref<128x128xbf16, #tpu.memory_space<vmem>>, vector<128x128xbf16>
    %c0_1 = arith.constant 0 : index
    %c0_2 = arith.constant 0 : index
    %1 = vector.load %arg2[%c0_1, %c0_2] : memref<128x128xbf16, #tpu.memory_space<vmem>>, vector<128x128xbf16>
    %cst = arith.constant dense<0.000000e+00> : vector<128x128xf32>
    %2 = tpu.matmul %0, %1, %cst {dimension_numbers = #tpu.dot_dimension_numbers<[1], [0], [0], [1], [0, 0, 1, 1], [], []>} : vector<128x128xbf16>, vector<128x128xbf16>, vector<128x128xf32> -> vector<128x128xf32>
    %c0_3 = arith.constant 0 : index
    %c0_4 = arith.constant 0 : index
    %3 = vector.load %arg3[%c0_3, %c0_4] : memref<128x1xf32, #tpu.memory_space<vmem>>, vector<128x1xf32>
    %4 = vector.broadcast %3 : vector<128x1xf32> to vector<128x128xf32>
    %5 = arith.mulf %4, %2 : vector<128x128xf32>
    %6 = arith.truncf %5 : vector<128x128xf32> to vector<128x128xbf16>
    %c0_5 = arith.constant 0 : index
    %c0_6 = arith.constant 0 : index
    %7 = vector.load %arg4[%c0_5, %c0_6] : memref<128x128xbf16, #tpu.memory_space<vmem>>, vector<128x128xbf16>
    tpu.vector_store %arg4[%c0_5, %c0_6], %6 {strides = array<i32>} : memref<128x128xbf16, #tpu.memory_space<vmem>>, vector<128x128xbf16>,
    return
  }
  func.func @transform_0(%arg0: i32) -> (i32, i32) {
    %c0_i32 = arith.constant 0 : i32
    %c0_i32_0 = arith.constant 0 : i32
    return %arg0, %c0_i32 : i32, i32
  }
  func.func @transform_1(%arg0: i32) -> (i32, i32) {
    %c0_i32 = arith.constant 0 : i32
    %c0_i32_0 = arith.constant 0 : i32
    %c0_i32_1 = arith.constant 0 : i32
    return %c0_i32, %c0_i32_0 : i32, i32
  }
  func.func @transform_2(%arg0: i32) -> (i32, i32) {
    %c0_i32 = arith.constant 0 : i32
    %c0_i32_0 = arith.constant 0 : i32
    return %arg0, %c0_i32 : i32, i32
  }
  func.func @transform_3(%arg0: i32) -> (i32, i32) {
    %c0_i32 = arith.constant 0 : i32
    %c0_i32_0 = arith.constant 0 : i32
    return %arg0, %c0_i32 : i32, i32
  }
}

module attributes {stable_mosaic.version = 11 : i64} {
  func.func @_gcn_agg_kernel(%arg0: i32, %arg1: i32, %arg2: memref<128x128xbf16, #tpu.memory_space<vmem>>, %arg3: memref<128x128xbf16, #tpu.memory_space<vmem>>, %arg4: memref<128x1xf32, #tpu.memory_space<vmem>>, %arg5: memref<1x128xf32, #tpu.memory_space<vmem>>, %arg6: memref<128x128xbf16, #tpu.memory_space<vmem>>, %arg7: memref<128x128xbf16, #tpu.memory_space<vmem>>, %arg8: memref<128x128xf32, #tpu.memory_space<vmem>>) attributes {dimension_semantics = [#tpu.dimension_semantics<parallel>, #tpu.dimension_semantics<arbitrary>], iteration_bounds = array<i64: 1, 1>, scalar_prefetch = 0 : i64, scratch_operands = 1 : i64, tpu.core_type = #tpu.core_type<tc>, window_params = [{transform_indices = @transform_0, window_bounds = array<i64: 128, 128>}, {transform_indices = @transform_1, window_bounds = array<i64: 128, 128>}, {transform_indices = @transform_2, window_bounds = array<i64: 128, 1>}, {pipeline_mode = #tpu.pipeline_mode<synchronous>, transform_indices = @transform_3, window_bounds = array<i64: 1, 128>}, {transform_indices = @transform_4, window_bounds = array<i64: 128, 128>}, {transform_indices = @transform_5, window_bounds = array<i64: 128, 128>}]} {
    %c0_i32 = arith.constant 0 : i32
    %0 = arith.cmpi eq, %arg1, %c0_i32 : i32
    %1 = arith.extui %0 : i1 to i32
    %c0_i32_0 = arith.constant 0 : i32
    %2 = arith.cmpi ne, %1, %c0_i32_0 : i32
    scf.if %2 {
      %cst_10 = arith.constant 0.000000e+00 : f32
      %12 = vector.broadcast %cst_10 : f32 to vector<128x128xf32>
      %c0_11 = arith.constant 0 : index
      %c0_12 = arith.constant 0 : index
      %13 = vector.load %arg8[%c0_11, %c0_12] : memref<128x128xf32, #tpu.memory_space<vmem>>, vector<128x128xf32>
      tpu.vector_store %arg8[%c0_11, %c0_12], %12 {strides = array<i32>} : memref<128x128xf32, #tpu.memory_space<vmem>>, vector<128x128xf32>,
    } else {
    }
    %c0 = arith.constant 0 : index
    %c0_1 = arith.constant 0 : index
    %3 = vector.load %arg8[%c0, %c0_1] : memref<128x128xf32, #tpu.memory_space<vmem>>, vector<128x128xf32>
    %c0_2 = arith.constant 0 : index
    %c0_3 = arith.constant 0 : index
    %4 = vector.load %arg2[%c0_2, %c0_3] : memref<128x128xbf16, #tpu.memory_space<vmem>>, vector<128x128xbf16>
    %c0_4 = arith.constant 0 : index
    %c0_5 = arith.constant 0 : index
    %5 = vector.load %arg3[%c0_4, %c0_5] : memref<128x128xbf16, #tpu.memory_space<vmem>>, vector<128x128xbf16>
    %cst = arith.constant dense<0.000000e+00> : vector<128x128xf32>
    %6 = tpu.matmul %4, %5, %cst {dimension_numbers = #tpu.dot_dimension_numbers<[1], [0], [0], [1], [0, 0, 1, 1], [], []>} : vector<128x128xbf16>, vector<128x128xbf16>, vector<128x128xf32> -> vector<128x128xf32>
    %7 = arith.addf %3, %6 : vector<128x128xf32>
    %c0_6 = arith.constant 0 : index
    %c0_7 = arith.constant 0 : index
    %8 = vector.load %arg8[%c0_6, %c0_7] : memref<128x128xf32, #tpu.memory_space<vmem>>, vector<128x128xf32>
    tpu.vector_store %arg8[%c0_6, %c0_7], %7 {strides = array<i32>} : memref<128x128xf32, #tpu.memory_space<vmem>>, vector<128x128xf32>,
    %c0_i32_8 = arith.constant 0 : i32
    %9 = arith.cmpi eq, %arg1, %c0_i32_8 : i32
    %10 = arith.extui %9 : i1 to i32
    %c0_i32_9 = arith.constant 0 : i32
    %11 = arith.cmpi ne, %10, %c0_i32_9 : i32
    scf.if %11 {
      %c0_10 = arith.constant 0 : index
      %c0_11 = arith.constant 0 : index
      %12 = vector.load %arg4[%c0_10, %c0_11] : memref<128x1xf32, #tpu.memory_space<vmem>>, vector<128x1xf32>
      %c0_12 = arith.constant 0 : index
      %c0_13 = arith.constant 0 : index
      %13 = vector.load %arg8[%c0_12, %c0_13] : memref<128x128xf32, #tpu.memory_space<vmem>>, vector<128x128xf32>
      %14 = vector.broadcast %12 : vector<128x1xf32> to vector<128x128xf32>
      %15 = arith.mulf %14, %13 : vector<128x128xf32>
      %c0_14 = arith.constant 0 : index
      %c0_15 = arith.constant 0 : index
      %16 = vector.load %arg5[%c0_14, %c0_15] : memref<1x128xf32, #tpu.memory_space<vmem>>, vector<1x128xf32>
      %17 = vector.broadcast %16 : vector<1x128xf32> to vector<128x128xf32>
      %18 = arith.addf %15, %17 : vector<128x128xf32>
      %cst_16 = arith.constant 0.000000e+00 : f32
      %19 = vector.broadcast %cst_16 : f32 to vector<128x128xf32>
      %20 = arith.maximumf %18, %19 : vector<128x128xf32>
      %c0_17 = arith.constant 0 : index
      %c0_18 = arith.constant 0 : index
      %21 = vector.load %arg6[%c0_17, %c0_18] : memref<128x128xbf16, #tpu.memory_space<vmem>>, vector<128x128xbf16>
      %22 = arith.extf %21 : vector<128x128xbf16> to vector<128x128xf32>
      %23 = arith.addf %22, %20 : vector<128x128xf32>
      %24 = arith.truncf %23 : vector<128x128xf32> to vector<128x128xbf16>
      %c0_19 = arith.constant 0 : index
      %c0_20 = arith.constant 0 : index
      %25 = vector.load %arg7[%c0_19, %c0_20] : memref<128x128xbf16, #tpu.memory_space<vmem>>, vector<128x128xbf16>
      tpu.vector_store %arg7[%c0_19, %c0_20], %24 {strides = array<i32>} : memref<128x128xbf16, #tpu.memory_space<vmem>>, vector<128x128xbf16>,
    } else {
    }
    return
  }
  func.func @transform_0(%arg0: i32, %arg1: i32) -> (i32, i32) {
    %c0_i32 = arith.constant 0 : i32
    return %arg0, %arg1 : i32, i32
  }
  func.func @transform_1(%arg0: i32, %arg1: i32) -> (i32, i32) {
    %c0_i32 = arith.constant 0 : i32
    %c0_i32_0 = arith.constant 0 : i32
    return %arg1, %c0_i32 : i32, i32
  }
  func.func @transform_2(%arg0: i32, %arg1: i32) -> (i32, i32) {
    %c0_i32 = arith.constant 0 : i32
    %c0_i32_0 = arith.constant 0 : i32
    return %arg0, %c0_i32 : i32, i32
  }
  func.func @transform_3(%arg0: i32, %arg1: i32) -> (i32, i32) {
    %c0_i32 = arith.constant 0 : i32
    %c0_i32_0 = arith.constant 0 : i32
    %c0_i32_1 = arith.constant 0 : i32
    return %c0_i32, %c0_i32_0 : i32, i32
  }
  func.func @transform_4(%arg0: i32, %arg1: i32) -> (i32, i32) {
    %c0_i32 = arith.constant 0 : i32
    %c0_i32_0 = arith.constant 0 : i32
    return %arg0, %c0_i32 : i32, i32
  }
  func.func @transform_5(%arg0: i32, %arg1: i32) -> (i32, i32) {
    %c0_i32 = arith.constant 0 : i32
    %c0_i32_0 = arith.constant 0 : i32
    return %arg0, %c0_i32 : i32, i32
  }
}

module attributes {stable_mosaic.version = 11 : i64} {
  func.func @_gcn_head_kernel(%arg0: i32, %arg1: i32, %arg2: memref<128x128xbf16, #tpu.memory_space<vmem>>, %arg3: memref<128x128xbf16, #tpu.memory_space<vmem>>, %arg4: memref<128x1xf32, #tpu.memory_space<vmem>>, %arg5: memref<1x128xf32, #tpu.memory_space<vmem>>, %arg6: memref<128x128xbf16, #tpu.memory_space<vmem>>, %arg7: memref<128x128xbf16, #tpu.memory_space<vmem>>, %arg8: memref<1x128xf32, #tpu.memory_space<vmem>>, %arg9: memref<1x128xf32, #tpu.memory_space<vmem>>, %arg10: memref<1xf32, #tpu.memory_space<smem>>, %arg11: memref<1x128xf32, #tpu.memory_space<vmem>>, %arg12: memref<128x128xbf16, #tpu.memory_space<vmem>>, %arg13: memref<1x128xf32, #tpu.memory_space<vmem>>, %arg14: memref<128x128xf32, #tpu.memory_space<vmem>>, %arg15: memref<128x128xf32, #tpu.memory_space<vmem>>) attributes {dimension_semantics = [#tpu.dimension_semantics<parallel>, #tpu.dimension_semantics<arbitrary>], iteration_bounds = array<i64: 1, 1>, scalar_prefetch = 0 : i64, scratch_operands = 1 : i64, tpu.core_type = #tpu.core_type<tc>, window_params = [{transform_indices = @transform_0, window_bounds = array<i64: 128, 128>}, {transform_indices = @transform_1, window_bounds = array<i64: 128, 128>}, {transform_indices = @transform_2, window_bounds = array<i64: 128, 1>}, {pipeline_mode = #tpu.pipeline_mode<synchronous>, transform_indices = @transform_3, window_bounds = array<i64: 1, 128>}, {transform_indices = @transform_4, window_bounds = array<i64: 128, 128>}, {pipeline_mode = #tpu.pipeline_mode<synchronous>, transform_indices = @transform_5, window_bounds = array<i64: 128, 128>}, {pipeline_mode = #tpu.pipeline_mode<synchronous>, transform_indices = @transform_6, window_bounds = array<i64: 1, 128>}, {pipeline_mode = #tpu.pipeline_mode<synchronous>, transform_indices = @transform_7, window_bounds = array<i64: 1, 128>}, {transform_indices = @transform_8, window_bounds = array<i64: 1>}, {pipeline_mode = #tpu.pipeline_mode<synchronous>, transform_indices = @transform_9, window_bounds = array<i64: 1, 128>}, {pipeline_mode = #tpu.pipeline_mode<synchronous>, transform_indices = @transform_10, window_bounds = array<i64: 128, 128>}, {pipeline_mode = #tpu.pipeline_mode<synchronous>, transform_indices = @transform_11, window_bounds = array<i64: 1, 128>}, {transform_indices = @transform_12, window_bounds = array<i64: 128, 128>}]} {
    %c0_i32 = arith.constant 0 : i32
    %0 = arith.cmpi eq, %arg1, %c0_i32 : i32
    %1 = arith.extui %0 : i1 to i32
    %c0_i32_0 = arith.constant 0 : i32
    %2 = arith.cmpi ne, %1, %c0_i32_0 : i32
    scf.if %2 {
      %cst_10 = arith.constant 0.000000e+00 : f32
      %12 = vector.broadcast %cst_10 : f32 to vector<128x128xf32>
      %c0_11 = arith.constant 0 : index
      %c0_12 = arith.constant 0 : index
      %13 = vector.load %arg15[%c0_11, %c0_12] : memref<128x128xf32, #tpu.memory_space<vmem>>, vector<128x128xf32>
      tpu.vector_store %arg15[%c0_11, %c0_12], %12 {strides = array<i32>} : memref<128x128xf32, #tpu.memory_space<vmem>>, vector<128x128xf32>,
    } else {
    }
    %c0 = arith.constant 0 : index
    %c0_1 = arith.constant 0 : index
    %3 = vector.load %arg15[%c0, %c0_1] : memref<128x128xf32, #tpu.memory_space<vmem>>, vector<128x128xf32>
    %c0_2 = arith.constant 0 : index
    %c0_3 = arith.constant 0 : index
    %4 = vector.load %arg2[%c0_2, %c0_3] : memref<128x128xbf16, #tpu.memory_space<vmem>>, vector<128x128xbf16>
    %c0_4 = arith.constant 0 : index
    %c0_5 = arith.constant 0 : index
    %5 = vector.load %arg3[%c0_4, %c0_5] : memref<128x128xbf16, #tpu.memory_space<vmem>>, vector<128x128xbf16>
    %cst = arith.constant dense<0.000000e+00> : vector<128x128xf32>
    %6 = tpu.matmul %4, %5, %cst {dimension_numbers = #tpu.dot_dimension_numbers<[1], [0], [0], [1], [0, 0, 1, 1], [], []>} : vector<128x128xbf16>, vector<128x128xbf16>, vector<128x128xf32> -> vector<128x128xf32>
    %7 = arith.addf %3, %6 : vector<128x128xf32>
    %c0_6 = arith.constant 0 : index
    %c0_7 = arith.constant 0 : index
    %8 = vector.load %arg15[%c0_6, %c0_7] : memref<128x128xf32, #tpu.memory_space<vmem>>, vector<128x128xf32>
    tpu.vector_store %arg15[%c0_6, %c0_7], %7 {strides = array<i32>} : memref<128x128xf32, #tpu.memory_space<vmem>>, vector<128x128xf32>,
    %c0_i32_8 = arith.constant 0 : i32
    %9 = arith.cmpi eq, %arg1, %c0_i32_8 : i32
    %10 = arith.extui %9 : i1 to i32
    %c0_i32_9 = arith.constant 0 : i32
    %11 = arith.cmpi ne, %10, %c0_i32_9 : i32
    scf.if %11 {
      %c0_10 = arith.constant 0 : index
      %c0_11 = arith.constant 0 : index
      %12 = vector.load %arg4[%c0_10, %c0_11] : memref<128x1xf32, #tpu.memory_space<vmem>>, vector<128x1xf32>
      %c0_12 = arith.constant 0 : index
      %c0_13 = arith.constant 0 : index
      %13 = vector.load %arg15[%c0_12, %c0_13] : memref<128x128xf32, #tpu.memory_space<vmem>>, vector<128x128xf32>
      %14 = vector.broadcast %12 : vector<128x1xf32> to vector<128x128xf32>
      %15 = arith.mulf %14, %13 : vector<128x128xf32>
      %c0_14 = arith.constant 0 : index
      %c0_15 = arith.constant 0 : index
      %16 = vector.load %arg5[%c0_14, %c0_15] : memref<1x128xf32, #tpu.memory_space<vmem>>, vector<1x128xf32>
      %17 = vector.broadcast %16 : vector<1x128xf32> to vector<128x128xf32>
      %18 = arith.addf %15, %17 : vector<128x128xf32>
      %c0_16 = arith.constant 0 : index
      %c0_17 = arith.constant 0 : index
      %19 = vector.load %arg6[%c0_16, %c0_17] : memref<128x128xbf16, #tpu.memory_space<vmem>>, vector<128x128xbf16>
      %20 = arith.extf %19 : vector<128x128xbf16> to vector<128x128xf32>
      %cst_18 = arith.constant 0.000000e+00 : f32
      %21 = vector.broadcast %cst_18 : f32 to vector<128x128xf32>
      %22 = arith.maximumf %18, %21 : vector<128x128xf32>
      %23 = arith.addf %20, %22 : vector<128x128xf32>
      %24 = arith.truncf %23 : vector<128x128xf32> to vector<128x128xbf16>
      %c0_19 = arith.constant 0 : index
      %c0_20 = arith.constant 0 : index
      %25 = vector.load %arg7[%c0_19, %c0_20] : memref<128x128xbf16, #tpu.memory_space<vmem>>, vector<128x128xbf16>
      %cst_21 = arith.constant dense<0.000000e+00> : vector<128x128xf32>
      %26 = tpu.matmul %24, %25, %cst_21 {dimension_numbers = #tpu.dot_dimension_numbers<[1], [0], [0], [1], [0, 0, 1, 1], [], []>} : vector<128x128xbf16>, vector<128x128xbf16>, vector<128x128xf32> -> vector<128x128xf32>
      %c0_22 = arith.constant 0 : index
      %c0_23 = arith.constant 0 : index
      %27 = vector.load %arg8[%c0_22, %c0_23] : memref<1x128xf32, #tpu.memory_space<vmem>>, vector<1x128xf32>
      %28 = vector.broadcast %27 : vector<1x128xf32> to vector<128x128xf32>
      %29 = arith.addf %26, %28 : vector<128x128xf32>
      %cst_24 = arith.constant 0.000000e+00 : f32
      %30 = vector.broadcast %cst_24 : f32 to vector<128x128xf32>
      %31 = arith.maximumf %29, %30 : vector<128x128xf32>
      %c0_25 = arith.constant 0 : index
      %c0_26 = arith.constant 0 : index
      %32 = vector.load %arg9[%c0_25, %c0_26] : memref<1x128xf32, #tpu.memory_space<vmem>>, vector<1x128xf32>
      %33 = vector.broadcast %32 : vector<1x128xf32> to vector<128x128xf32>
      %34 = arith.mulf %31, %33 : vector<128x128xf32>
      %cst_27 = arith.constant dense<0.000000e+00> : vector<128xf32>
      %35 = vector.multi_reduction <add>, %34, %cst_27 [1] : vector<128x128xf32> to vector<128xf32>
      %36 = vector.shape_cast %35 : vector<128xf32> to vector<128x1xf32>
      %c0_28 = arith.constant 0 : index
      %37 = memref.load %arg10[%c0_28] : memref<1xf32, #tpu.memory_space<smem>>
      %38 = vector.broadcast %37 : f32 to vector<128x1xf32>
      %39 = arith.addf %36, %38 : vector<128x1xf32>
      %40 = arith.negf %39 : vector<128x1xf32>
      %41 = math.exp %40 : vector<128x1xf32>
      %cst_29 = arith.constant 1.000000e+00 : f32
      %42 = vector.broadcast %cst_29 : f32 to vector<128x1xf32>
      %43 = arith.addf %42, %41 : vector<128x1xf32>
      %44 = arith.divf %42, %43 : vector<128x1xf32>
      %45 = vector.broadcast %44 : vector<128x1xf32> to vector<128x128xf32>
      %46 = arith.mulf %45, %26 : vector<128x128xf32>
      %c0_30 = arith.constant 0 : index
      %c0_31 = arith.constant 0 : index
      %47 = vector.load %arg11[%c0_30, %c0_31] : memref<1x128xf32, #tpu.memory_space<vmem>>, vector<1x128xf32>
      %48 = vector.broadcast %47 : vector<1x128xf32> to vector<128x128xf32>
      %49 = arith.addf %46, %48 : vector<128x128xf32>
      %cst_32 = arith.constant 0.000000e+00 : f32
      %50 = vector.broadcast %cst_32 : f32 to vector<128x128xf32>
      %51 = arith.maximumf %49, %50 : vector<128x128xf32>
      %52 = arith.truncf %51 : vector<128x128xf32> to vector<128x128xbf16>
      %c0_33 = arith.constant 0 : index
      %c0_34 = arith.constant 0 : index
      %53 = vector.load %arg12[%c0_33, %c0_34] : memref<128x128xbf16, #tpu.memory_space<vmem>>, vector<128x128xbf16>
      %cst_35 = arith.constant dense<0.000000e+00> : vector<128x128xf32>
      %54 = tpu.matmul %52, %53, %cst_35 {dimension_numbers = #tpu.dot_dimension_numbers<[1], [0], [0], [1], [0, 0, 1, 1], [], []>} : vector<128x128xbf16>, vector<128x128xbf16>, vector<128x128xf32> -> vector<128x128xf32>
      %c0_36 = arith.constant 0 : index
      %c0_37 = arith.constant 0 : index
      %55 = vector.load %arg13[%c0_36, %c0_37] : memref<1x128xf32, #tpu.memory_space<vmem>>, vector<1x128xf32>
      %56 = vector.broadcast %55 : vector<1x128xf32> to vector<128x128xf32>
      %57 = arith.addf %54, %56 : vector<128x128xf32>
      %c0_38 = arith.constant 0 : index
      %c0_39 = arith.constant 0 : index
      %58 = vector.load %arg14[%c0_38, %c0_39] : memref<128x128xf32, #tpu.memory_space<vmem>>, vector<128x128xf32>
      tpu.vector_store %arg14[%c0_38, %c0_39], %57 {strides = array<i32>} : memref<128x128xf32, #tpu.memory_space<vmem>>, vector<128x128xf32>,
    } else {
    }
    return
  }
  func.func @transform_0(%arg0: i32, %arg1: i32) -> (i32, i32) {
    %c0_i32 = arith.constant 0 : i32
    return %arg0, %arg1 : i32, i32
  }
  func.func @transform_1(%arg0: i32, %arg1: i32) -> (i32, i32) {
    %c0_i32 = arith.constant 0 : i32
    %c0_i32_0 = arith.constant 0 : i32
    return %arg1, %c0_i32 : i32, i32
  }
  func.func @transform_2(%arg0: i32, %arg1: i32) -> (i32, i32) {
    %c0_i32 = arith.constant 0 : i32
    %c0_i32_0 = arith.constant 0 : i32
    return %arg0, %c0_i32 : i32, i32
  }
  func.func @transform_3(%arg0: i32, %arg1: i32) -> (i32, i32) {
    %c0_i32 = arith.constant 0 : i32
    %c0_i32_0 = arith.constant 0 : i32
    %c0_i32_1 = arith.constant 0 : i32
    return %c0_i32, %c0_i32_0 : i32, i32
  }
  func.func @transform_4(%arg0: i32, %arg1: i32) -> (i32, i32) {
    %c0_i32 = arith.constant 0 : i32
    %c0_i32_0 = arith.constant 0 : i32
    return %arg0, %c0_i32 : i32, i32
  }
  func.func @transform_5(%arg0: i32, %arg1: i32) -> (i32, i32) {
    %c0_i32 = arith.constant 0 : i32
    %c0_i32_0 = arith.constant 0 : i32
    %c0_i32_1 = arith.constant 0 : i32
    return %c0_i32, %c0_i32_0 : i32, i32
  }
  func.func @transform_6(%arg0: i32, %arg1: i32) -> (i32, i32) {
    %c0_i32 = arith.constant 0 : i32
    %c0_i32_0 = arith.constant 0 : i32
    %c0_i32_1 = arith.constant 0 : i32
    return %c0_i32, %c0_i32_0 : i32, i32
  }
  func.func @transform_7(%arg0: i32, %arg1: i32) -> (i32, i32) {
    %c0_i32 = arith.constant 0 : i32
    %c0_i32_0 = arith.constant 0 : i32
    %c0_i32_1 = arith.constant 0 : i32
    return %c0_i32, %c0_i32_0 : i32, i32
  }
  func.func @transform_8(%arg0: i32, %arg1: i32) -> i32 {
    %c0_i32 = arith.constant 0 : i32
    %c0_i32_0 = arith.constant 0 : i32
    return %c0_i32 : i32
  }
  func.func @transform_9(%arg0: i32, %arg1: i32) -> (i32, i32) {
    %c0_i32 = arith.constant 0 : i32
    %c0_i32_0 = arith.constant 0 : i32
    %c0_i32_1 = arith.constant 0 : i32
    return %c0_i32, %c0_i32_0 : i32, i32
  }
  func.func @transform_10(%arg0: i32, %arg1: i32) -> (i32, i32) {
    %c0_i32 = arith.constant 0 : i32
    %c0_i32_0 = arith.constant 0 : i32
    %c0_i32_1 = arith.constant 0 : i32
    return %c0_i32, %c0_i32_0 : i32, i32
  }
  func.func @transform_11(%arg0: i32, %arg1: i32) -> (i32, i32) {
    %c0_i32 = arith.constant 0 : i32
    %c0_i32_0 = arith.constant 0 : i32
    %c0_i32_1 = arith.constant 0 : i32
    return %c0_i32, %c0_i32_0 : i32, i32
  }
  func.func @transform_12(%arg0: i32, %arg1: i32) -> (i32, i32) {
    %c0_i32 = arith.constant 0 : i32
    %c0_i32_0 = arith.constant 0 : i32
    return %arg0, %c0_i32 : i32, i32
  }
}

</mosaic_0001>

<bundles_post_ra>
// kernel: clutter_classification_gnn.7
= control target key start
LH: loop header
LB: loop body
LE: loop exit
PB: predicated region body
PF: predicated region fallthrough
CT: control target
= control target key end

     0   :  { %v744_v1 = vmov 0   ;;  %s914_s1 = inlined_call_operand.vmem [shape: bf16[128,128], index: 1, kind: input, shape index: {}]   ;;  %s915_s0 = inlined_call_operand.vmem [shape: bf16[128,128], index: 0, kind: input, shape index: {}]   ;;  %s916_s2 = inlined_call_operand.vmem [shape: f32[128,1], index: 2, kind: input, shape index: {}]   ;;  %s917_s3 = inlined_call_operand.vmem [shape: f32[1,128], index: 3, kind: input, shape index: {}]   ;;  %s918_s4 = inlined_call_operand.vmem [shape: bf16[128,128], index: 4, kind: output, shape index: {}]  }
   0x1   :  { %v728_v0 = vld [vmem:[%s914_s1 + $0x38] sm:$0xff]   ;;  %727 = vset.pattern.permute.xlu1 %v744_v1  ;;  %726 = vset.pattern.permute.xlu0 %v744_v1  ;;  %v729_v2 = vld [vmem:[%s914_s1 + $0x30] sm:$0xff]   ;;  %v730_v3 = vld [vmem:[%s914_s1 + $0x28] sm:$0xff]  }
   0x2   :  { %677 = vmatprep.subr.bf16.mxu0 %v728_v0  ;;  %709 = vmatprep.subr.bf16.mxu1 %v728_v0  ;;  %v731_v4 = vld [vmem:[%s914_s1 + $0x20] sm:$0xff]   ;;  %v732_v7 = vld [vmem:[%s914_s1 + $0x18] sm:$0xff]   ;;  %v733_v8 = vld [vmem:[%s914_s1 + $0x10] sm:$0xff]  }
   0x3   :  { %678 = vmatpush3.bf16.msra.mxu0 %v728_v0  ;;  %717 = vmatpush3.bf16.msra.mxu1 %v728_v0  ;;  %v736_v5 = vld [vmem:[%s915_s0] sm:$0xff]   ;;  %v316_v9 = vld [vmem:[%s916_s2 + $0x10] sm:$0xff]  ;;  %v317_v11 = vld [vmem:[%s916_s2 + $0x18] sm:$0xff] }
   0x4   :  { %679 = vmatprep.subr.bf16.mxu0 %v729_v2  ;;  %710 = vmatprep.subr.bf16.mxu1 %v729_v2  ;;  %v737_v6 = vld [vmem:[%s915_s0 + $0x20] sm:$0xff]   ;;  %v315_v12 = vld [vmem:[%s916_s2 + $0x8] sm:$0xff]  ;;  %v321_v17 = vld [vmem:[%s916_s2 + $0x38] sm:$0xff] }
   0x5   :  { %693 = vmatprep.mubr.bf16.mxu0 %v736_v5  ;;  %701 = vmatprep.mubr.bf16.mxu1 %v737_v6  ;;  %v314_v10 = vld [vmem:[%s916_s2] sm:$0xff]  ;;  %v734_v13 = vld [vmem:[%s914_s1 + $0x8] sm:$0xff]   ;;  %v320_v18 = vld [vmem:[%s916_s2 + $0x30] sm:$0xff] }
   0x6   :  { %358 = vperm.xlu1 %727, %v316_v9   ;;  %348 = vperm.xlu0 %726, %v314_v10   ;;  %v319_v14 = vld [vmem:[%s916_s2 + $0x28] sm:$0xff]  ;;  %v318_v15 = vld [vmem:[%s916_s2 + $0x20] sm:$0xff]  ;;  %v740_v23 = vld [vmem:[%s915_s0 + $0x10] sm:$0xff]  }
   0x7   :  { %680 = vmatpush3.bf16.msra.mxu0 %v729_v2  ;;  %718 = vmatpush3.bf16.msra.mxu1 %v729_v2  ;;  %v735_v16 = vld [vmem:[%s914_s1] sm:$0xff]   ;;  %v738_v19 = vld [vmem:[%s915_s0 + $0x8] sm:$0xff]   ;;  %v741_v24 = vld [vmem:[%s915_s0 + $0x30] sm:$0xff]  }
   0x8   :  { %681 = vmatprep.subr.bf16.mxu0 %v730_v3  ;;  %711 = vmatprep.subr.bf16.mxu1 %v730_v3  ;;  %v739_v20 = vld [vmem:[%s915_s0 + $0x28] sm:$0xff]   ;;  %v322_v22 = vld [vmem:[%s916_s2 + $0x40] sm:$0xff]  ;;  %v325_v25 = vld [vmem:[%s916_s2 + $0x58] sm:$0xff] }
   0x9   :  { %v323_v21 = vld [vmem:[%s916_s2 + $0x48] sm:$0xff]  ;;  %v324_v26 = vld [vmem:[%s916_s2 + $0x50] sm:$0xff]  ;;  %v742_v27 = vld [vmem:[%s915_s0 + $0x18] sm:$0xff]  }
   0xa   :  { %363 = vperm.xlu1 %727, %v317_v11   ;;  %353 = vperm.xlu0 %726, %v315_v12   ;;  %v743_v28 = vld [vmem:[%s915_s0 + $0x38] sm:$0xff]   ;;  %v327_v29 = vld [vmem:[%s916_s2 + $0x68] sm:$0xff]  ;;  %v326_v30 = vld [vmem:[%s916_s2 + $0x60] sm:$0xff] }
   0xb   :  { %682 = vmatpush3.bf16.msra.mxu0 %v730_v3  ;;  %719 = vmatpush3.bf16.msra.mxu1 %v730_v3  ;;  %v329_v31 = vld [vmem:[%s916_s2 + $0x78] sm:$0xff]  ;;  %v328_v32 = vld [vmem:[%s916_s2 + $0x70] sm:$0xff]  ;;  %v871_v49 = vld [vmem:[%s917_s3] ss:$0 sm:$0xff] }
   0xc   :  { %683 = vmatprep.subr.bf16.mxu0 %v731_v4  ;;  %712 = vmatprep.subr.bf16.mxu1 %v731_v4 }
   0xe   :  { %373 = vperm.xlu1 %727, %v319_v14   ;;  %368 = vperm.xlu0 %726, %v318_v15  }
   0xf   :  { %684 = vmatpush3.bf16.msra.mxu0 %v731_v4  ;;  %720 = vmatpush3.bf16.msra.mxu1 %v731_v4 }
  0x10   :  { %685 = vmatprep.subr.bf16.mxu0 %v732_v7  ;;  %713 = vmatprep.subr.bf16.mxu1 %v732_v7 }
  0x12   :  { %383 = vperm.xlu1 %727, %v321_v17   ;;  %378 = vperm.xlu0 %726, %v320_v18  }
  0x13   :  { %686 = vmatpush3.bf16.msra.mxu0 %v732_v7  ;;  %721 = vmatpush3.bf16.msra.mxu1 %v732_v7 }
  0x14   :  { %687 = vmatprep.subr.bf16.mxu0 %v733_v8  ;;  %714 = vmatprep.subr.bf16.mxu1 %v733_v8 }
  0x16   :  { %393 = vperm.xlu1 %727, %v323_v21   ;;  %388 = vperm.xlu0 %726, %v322_v22  }
  0x17   :  { %688 = vmatpush3.bf16.msra.mxu0 %v733_v8  ;;  %722 = vmatpush3.bf16.msra.mxu1 %v733_v8 }
  0x18   :  { %689 = vmatprep.subr.bf16.mxu0 %v734_v13  ;;  %715 = vmatprep.subr.bf16.mxu1 %v734_v13 }
  0x1a   :  { %403 = vperm.xlu1 %727, %v325_v25   ;;  %398 = vperm.xlu0 %726, %v324_v26  }
  0x1b   :  { %690 = vmatpush3.bf16.msra.mxu0 %v734_v13  ;;  %723 = vmatpush3.bf16.msra.mxu1 %v734_v13 }
  0x1c   :  { %691 = vmatprep.subr.bf16.mxu0 %v735_v16  ;;  %716 = vmatprep.subr.bf16.mxu1 %v735_v16 }
  0x1e   :  { %413 = vperm.xlu1 %727, %v327_v29   ;;  %408 = vperm.xlu0 %726, %v326_v30  }
  0x1f   :  { %692 = vmatpush3.bf16.msra.mxu0 %v735_v16  ;;  %724 = vmatpush3.bf16.msra.mxu1 %v735_v16 }
  0x22   :  { %694 = vmatmul.mubr.bf16.vlgmr.msra.gmra.mxu0 %v738_v19  ;;  %702 = vmatmul.mubr.bf16.vlgmr.msra.gmra.mxu1 %v739_v20 }
  0x23   :  { %697 = vmatprep.mubr.bf16.mxu0 %v740_v23  ;;  %705 = vmatprep.mubr.bf16.mxu1 %v741_v24 }
  0x24   :  { %423 = vperm.xlu1 %727, %v329_v31   ;;  %418 = vperm.xlu0 %726, %v328_v32  }
  0x2a   :  { %698 = vmatmul.mubr.bf16.gmra.mxu0 %v742_v27  ;;  %706 = vmatmul.mubr.bf16.gmra.mxu1 %v743_v28 }
  0x81   :  { %v349_v33 = vpop.permute.xlu0 %348  ;;  %v359_v34 = vpop.permute.xlu1 %358 }
  0x85   :  { %v354_v35 = vpop.permute.xlu0 %353  ;;  %v364_v36 = vpop.permute.xlu1 %363 }
  0x89   :  { %v369_v37 = vpop.permute.xlu0 %368  ;;  %v866_v38 = vpop.permute.xlu1 %373 }
  0x8d   :  { %v379_v39 = vpop.permute.xlu0 %378  ;;  %v384_v40 = vpop.permute.xlu1 %383 }
  0x91   :  { %v389_v41 = vpop.permute.xlu0 %388  ;;  %v394_v42 = vpop.permute.xlu1 %393 }
  0x95   :  { %v399_v43 = vpop.permute.xlu0 %398  ;;  %v404_v46 = vpop.permute.xlu1 %403 }
  0x99   :  { %v409_v52 = vpop.permute.xlu0 %408  ;;  %v414_v63 = vpop.permute.xlu1 %413 }
  0x9f   :  { %v419_v8 = vpop.permute.xlu0 %418  ;;  %v424_v29 = vpop.permute.xlu1 %423 }
  0xe2   :  { %v695_v44 = vpop.f32.mrf.mxu0  ;;  %v703_v45 = vpop.f32.mrf.mxu1 }
  0xe3   :  { %v428_v47 = vmul.f32 %v695_v44, %v359_v34  ;;  %v436_v48 = vmul.f32 %v703_v45, %v399_v43 }
  0xe4   :  { %v216_v50 = vpop.f32.mrf.mxu0  ;;  %v248_v51 = vpop.f32.mrf.mxu1 }
  0xe5   :  { %v426_v53 = vmul.f32 %v349_v33, %v216_v50  ;;  %v434_v54 = vmul.f32 %v389_v41, %v248_v51  ;;  %v451_v57 = vadd.f32 %v871_v49, %v428_v47  ;;  %v459_v58 = vadd.f32 %v871_v49, %v436_v48 }
  0xe6   :  { %v696_v55 = vpop.f32.mrf.mxu0  ;;  %v704_v56 = vpop.f32.mrf.mxu1 }
  0xe7   :  { %v429_v59 = vmul.f32 %v696_v55, %v364_v36  ;;  %v437_v60 = vmul.f32 %v704_v56, %v404_v46  ;;  %v449_v0 = vadd.f32 %v871_v49, %v426_v53  ;;  %v457_v1 = vadd.f32 %v871_v49, %v434_v54 }
  0xe8   :  { %v219_v61 = vpop.f32.mrf.mxu0  ;;  %v251_v62 = vpop.f32.mrf.mxu1  ;;  %v467_v9 = vmax.f32 %v451_v57, 0.0  ;;  %v475_v10 = vmax.f32 %v459_v58, 0.0 }
  0xe9   :  { %v427_v2 = vmul.f32 %v354_v35, %v219_v61  ;;  %v435_v3 = vmul.f32 %v394_v42, %v251_v62  ;;  %v452_v4 = vadd.f32 %v871_v49, %v429_v59  ;;  %v460_v5 = vadd.f32 %v871_v49, %v437_v60 }
  0xea   :  { %v699_v6 = vpop.f32.mrf.mxu0  ;;  %v707_v7 = vpop.f32.mrf.mxu1  ;;  %v465_v19 = vmax.f32 %v449_v0, 0.0  ;;  %v473_v20 = vmax.f32 %v457_v1, 0.0 }
  0xeb   :  { %v450_v11 = vadd.f32 %v871_v49, %v427_v2  ;;  %v458_v12 = vadd.f32 %v871_v49, %v435_v3  ;;  %v468_v13 = vmax.f32 %v452_v4, 0.0  ;;  %v476_v14 = vmax.f32 %v460_v5, 0.0 }
  0xec   :  { %v432_v15 = vmul.f32 %v699_v6, %v379_v39  ;;  %v440_v16 = vmul.f32 %v707_v7, %v419_v8  ;;  %v232_v17 = vpop.f32.mrf.mxu0  ;;  %v264_v18 = vpop.f32.mrf.mxu1 }
  0xed   :  { %v466_v21 = vmax.f32 %v450_v11, 0.0  ;;  %v474_v22 = vmax.f32 %v458_v12, 0.0  ;;  %v622_v23 = vpack.c.bf16 %v468_v13, %v467_v9  ;;  %v642_v24 = vpack.c.bf16 %v476_v14, %v475_v10 }
  0xee   :  { %v430_v25 = vmul.f32 %v369_v37, %v232_v17  ;;  %v438_v26 = vmul.f32 %v409_v52, %v264_v18  ;;  %v700_v27 = vpop.f32.mrf.mxu0  ;;  %v708_v28 = vpop.f32.mrf.mxu1  ;;  %v455_v32 = vadd.f32 %v871_v49, %v432_v15  ;;  %v463_v33 = vadd.f32 %v871_v49, %v440_v16 }
  0xef   :  { %v617_v30 = vpack.c.bf16 %v466_v21, %v465_v19  ;;  %v637_v31 = vpack.c.bf16 %v474_v22, %v473_v20  ;;  %654 = vst [vmem:[%s918_s4 + $0x8] sm:$0xff] %v622_v23   ;;  %658 = vst [vmem:[%s918_s4 + $0x28] sm:$0xff] %v642_v24   ;;  %v433_v34 = vmul.f32 %v700_v27, %v384_v40 }
  0xf0   :  { %v441_v35 = vmul.f32 %v708_v28, %v424_v29  ;;  %v235_v36 = vpop.f32.mrf.mxu0  ;;  %v267_v37 = vpop.f32.mrf.mxu1  ;;  %v453_v39 = vadd.f32 %v871_v49, %v430_v25  ;;  %v461_v41 = vadd.f32 %v871_v49, %v438_v26  ;;  %v471_v47 = vmax.f32 %v455_v32, 0.0 }
  0xf1   :  { %618 = vst [vmem:[%s918_s4] sm:$0xff] %v617_v30   ;;  %657 = vst [vmem:[%s918_s4 + $0x20] sm:$0xff] %v637_v31   ;;  %v431_v42 = vmul.f32 %v866_v38, %v235_v36  ;;  %v439_v43 = vmul.f32 %v414_v63, %v267_v37  ;;  %v456_v40 = vadd.f32 %v871_v49, %v433_v34  ;;  %v479_v48 = vmax.f32 %v463_v33, 0.0 }
  0xf2   :  { %v464_v44 = vadd.f32 %v871_v49, %v441_v35  ;;  %v469_v52 = vmax.f32 %v453_v39, 0.0  ;;  %v477_v53 = vmax.f32 %v461_v41, 0.0 }
  0xf3   :  { %v454_v45 = vadd.f32 %v871_v49, %v431_v42  ;;  %v462_v46 = vadd.f32 %v871_v49, %v439_v43  ;;  %v472_v50 = vmax.f32 %v456_v40, 0.0 }
  0xf4   :  { %v480_v51 = vmax.f32 %v464_v44, 0.0 }
  0xf5   :  { %v470_v54 = vmax.f32 %v454_v45, 0.0  ;;  %v478_v55 = vmax.f32 %v462_v46, 0.0  ;;  %v632_v56 = vpack.c.bf16 %v472_v50, %v471_v47 }
  0xf6   :  { %v652_v57 = vpack.c.bf16 %v480_v51, %v479_v48 }
  0xf7   :  { %v627_v38 = vpack.c.bf16 %v470_v54, %v469_v52  ;;  %v647_v58 = vpack.c.bf16 %v478_v55, %v477_v53  ;;  %656 = vst [vmem:[%s918_s4 + $0x18] sm:$0xff] %v632_v56  }
  0xf8   :  { %660 = vst [vmem:[%s918_s4 + $0x38] sm:$0xff] %v652_v57  }
  0xf9   :  { %655 = vst [vmem:[%s918_s4 + $0x10] sm:$0xff] %v627_v38   ;;  %659 = vst [vmem:[%s918_s4 + $0x30] sm:$0xff] %v647_v58  }

// kernel: clutter_classification_gnn.6
= control target key start
LH: loop header
LB: loop body
LE: loop exit
PB: predicated region body
PF: predicated region fallthrough
CT: control target
= control target key end

     0   :  { %v614_v1 = vmov 0   ;;  %s755_s1 = inlined_call_operand.vmem [shape: bf16[128,128], index: 1, kind: input, shape index: {}]   ;;  %s756_s0 = inlined_call_operand.vmem [shape: bf16[128,128], index: 0, kind: input, shape index: {}]   ;;  %s757_s2 = inlined_call_operand.vmem [shape: f32[128,1], index: 2, kind: input, shape index: {}]   ;;  %s758_s3 = inlined_call_operand.vmem [shape: bf16[128,128], index: 3, kind: output, shape index: {}]  }
   0x1   :  { %v598_v0 = vld [vmem:[%s755_s1 + $0x38] sm:$0xff]   ;;  %597 = vset.pattern.permute.xlu1 %v614_v1  ;;  %596 = vset.pattern.permute.xlu0 %v614_v1  ;;  %v599_v2 = vld [vmem:[%s755_s1 + $0x30] sm:$0xff]   ;;  %v600_v3 = vld [vmem:[%s755_s1 + $0x28] sm:$0xff]  }
   0x2   :  { %547 = vmatprep.subr.bf16.mxu0 %v598_v0  ;;  %579 = vmatprep.subr.bf16.mxu1 %v598_v0  ;;  %v601_v4 = vld [vmem:[%s755_s1 + $0x20] sm:$0xff]   ;;  %v602_v7 = vld [vmem:[%s755_s1 + $0x18] sm:$0xff]   ;;  %v603_v8 = vld [vmem:[%s755_s1 + $0x10] sm:$0xff]  }
   0x3   :  { %548 = vmatpush3.bf16.msra.mxu0 %v598_v0  ;;  %587 = vmatpush3.bf16.msra.mxu1 %v598_v0  ;;  %v606_v5 = vld [vmem:[%s756_s0] sm:$0xff]   ;;  %v242_v9 = vld [vmem:[%s757_s2 + $0x10] sm:$0xff]  ;;  %v243_v11 = vld [vmem:[%s757_s2 + $0x18] sm:$0xff] }
   0x4   :  { %549 = vmatprep.subr.bf16.mxu0 %v599_v2  ;;  %580 = vmatprep.subr.bf16.mxu1 %v599_v2  ;;  %v607_v6 = vld [vmem:[%s756_s0 + $0x20] sm:$0xff]   ;;  %v241_v12 = vld [vmem:[%s757_s2 + $0x8] sm:$0xff]  ;;  %v247_v17 = vld [vmem:[%s757_s2 + $0x38] sm:$0xff] }
   0x5   :  { %563 = vmatprep.mubr.bf16.mxu0 %v606_v5  ;;  %571 = vmatprep.mubr.bf16.mxu1 %v607_v6  ;;  %v240_v10 = vld [vmem:[%s757_s2] sm:$0xff]  ;;  %v604_v13 = vld [vmem:[%s755_s1 + $0x8] sm:$0xff]   ;;  %v246_v18 = vld [vmem:[%s757_s2 + $0x30] sm:$0xff] }
   0x6   :  { %268 = vperm.xlu1 %597, %v242_v9   ;;  %258 = vperm.xlu0 %596, %v240_v10   ;;  %v245_v14 = vld [vmem:[%s757_s2 + $0x28] sm:$0xff]  ;;  %v244_v15 = vld [vmem:[%s757_s2 + $0x20] sm:$0xff]  ;;  %v610_v23 = vld [vmem:[%s756_s0 + $0x10] sm:$0xff]  }
   0x7   :  { %550 = vmatpush3.bf16.msra.mxu0 %v599_v2  ;;  %588 = vmatpush3.bf16.msra.mxu1 %v599_v2  ;;  %v605_v16 = vld [vmem:[%s755_s1] sm:$0xff]   ;;  %v608_v19 = vld [vmem:[%s756_s0 + $0x8] sm:$0xff]   ;;  %v611_v24 = vld [vmem:[%s756_s0 + $0x30] sm:$0xff]  }
   0x8   :  { %551 = vmatprep.subr.bf16.mxu0 %v600_v3  ;;  %581 = vmatprep.subr.bf16.mxu1 %v600_v3  ;;  %v609_v20 = vld [vmem:[%s756_s0 + $0x28] sm:$0xff]   ;;  %v248_v22 = vld [vmem:[%s757_s2 + $0x40] sm:$0xff]  ;;  %v251_v25 = vld [vmem:[%s757_s2 + $0x58] sm:$0xff] }
   0x9   :  { %v249_v21 = vld [vmem:[%s757_s2 + $0x48] sm:$0xff]  ;;  %v250_v26 = vld [vmem:[%s757_s2 + $0x50] sm:$0xff]  ;;  %v612_v27 = vld [vmem:[%s756_s0 + $0x18] sm:$0xff]  }
   0xa   :  { %273 = vperm.xlu1 %597, %v243_v11   ;;  %263 = vperm.xlu0 %596, %v241_v12   ;;  %v613_v28 = vld [vmem:[%s756_s0 + $0x38] sm:$0xff]   ;;  %v253_v29 = vld [vmem:[%s757_s2 + $0x68] sm:$0xff]  ;;  %v252_v30 = vld [vmem:[%s757_s2 + $0x60] sm:$0xff] }
   0xb   :  { %552 = vmatpush3.bf16.msra.mxu0 %v600_v3  ;;  %589 = vmatpush3.bf16.msra.mxu1 %v600_v3  ;;  %v255_v31 = vld [vmem:[%s757_s2 + $0x78] sm:$0xff]  ;;  %v254_v32 = vld [vmem:[%s757_s2 + $0x70] sm:$0xff] }
   0xc   :  { %553 = vmatprep.subr.bf16.mxu0 %v601_v4  ;;  %582 = vmatprep.subr.bf16.mxu1 %v601_v4 }
   0xe   :  { %283 = vperm.xlu1 %597, %v245_v14   ;;  %278 = vperm.xlu0 %596, %v244_v15  }
   0xf   :  { %554 = vmatpush3.bf16.msra.mxu0 %v601_v4  ;;  %590 = vmatpush3.bf16.msra.mxu1 %v601_v4 }
  0x10   :  { %555 = vmatprep.subr.bf16.mxu0 %v602_v7  ;;  %583 = vmatprep.subr.bf16.mxu1 %v602_v7 }
  0x12   :  { %293 = vperm.xlu1 %597, %v247_v17   ;;  %288 = vperm.xlu0 %596, %v246_v18  }
  0x13   :  { %556 = vmatpush3.bf16.msra.mxu0 %v602_v7  ;;  %591 = vmatpush3.bf16.msra.mxu1 %v602_v7 }
  0x14   :  { %557 = vmatprep.subr.bf16.mxu0 %v603_v8  ;;  %584 = vmatprep.subr.bf16.mxu1 %v603_v8 }
  0x16   :  { %303 = vperm.xlu1 %597, %v249_v21   ;;  %298 = vperm.xlu0 %596, %v248_v22  }
  0x17   :  { %558 = vmatpush3.bf16.msra.mxu0 %v603_v8  ;;  %592 = vmatpush3.bf16.msra.mxu1 %v603_v8 }
  0x18   :  { %559 = vmatprep.subr.bf16.mxu0 %v604_v13  ;;  %585 = vmatprep.subr.bf16.mxu1 %v604_v13 }
  0x1a   :  { %313 = vperm.xlu1 %597, %v251_v25   ;;  %308 = vperm.xlu0 %596, %v250_v26  }
  0x1b   :  { %560 = vmatpush3.bf16.msra.mxu0 %v604_v13  ;;  %593 = vmatpush3.bf16.msra.mxu1 %v604_v13 }
  0x1c   :  { %561 = vmatprep.subr.bf16.mxu0 %v605_v16  ;;  %586 = vmatprep.subr.bf16.mxu1 %v605_v16 }
  0x1e   :  { %323 = vperm.xlu1 %597, %v253_v29   ;;  %318 = vperm.xlu0 %596, %v252_v30  }
  0x1f   :  { %562 = vmatpush3.bf16.msra.mxu0 %v605_v16  ;;  %594 = vmatpush3.bf16.msra.mxu1 %v605_v16 }
  0x22   :  { %564 = vmatmul.mubr.bf16.vlgmr.msra.gmra.mxu0 %v608_v19  ;;  %572 = vmatmul.mubr.bf16.vlgmr.msra.gmra.mxu1 %v609_v20 }
  0x23   :  { %567 = vmatprep.mubr.bf16.mxu0 %v610_v23  ;;  %575 = vmatprep.mubr.bf16.mxu1 %v611_v24 }
  0x24   :  { %333 = vperm.xlu1 %597, %v255_v31   ;;  %328 = vperm.xlu0 %596, %v254_v32  }
  0x2a   :  { %568 = vmatmul.mubr.bf16.gmra.mxu0 %v612_v27  ;;  %576 = vmatmul.mubr.bf16.gmra.mxu1 %v613_v28 }
  0x81   :  { %v269_v33 = vpop.permute.xlu1 %268  ;;  %v259_v34 = vpop.permute.xlu0 %258 }
  0x85   :  { %v274_v35 = vpop.permute.xlu1 %273  ;;  %v264_v36 = vpop.permute.xlu0 %263 }
  0x89   :  { %v284_v37 = vpop.permute.xlu1 %283  ;;  %v279_v38 = vpop.permute.xlu0 %278 }
  0x8d   :  { %v294_v39 = vpop.permute.xlu1 %293  ;;  %v289_v40 = vpop.permute.xlu0 %288 }
  0x91   :  { %v304_v41 = vpop.permute.xlu1 %303  ;;  %v299_v42 = vpop.permute.xlu0 %298 }
  0x95   :  { %v314_v43 = vpop.permute.xlu1 %313  ;;  %v309_v44 = vpop.permute.xlu0 %308 }
  0x99   :  { %v324_v51 = vpop.permute.xlu1 %323  ;;  %v319_v52 = vpop.permute.xlu0 %318 }
  0x9f   :  { %v334_v7 = vpop.permute.xlu1 %333  ;;  %v329_v8 = vpop.permute.xlu0 %328 }
  0xe2   :  { %v565_v45 = vpop.f32.mrf.mxu0  ;;  %v573_v46 = vpop.f32.mrf.mxu1 }
  0xe3   :  { %v338_v53 = vmul.f32 %v565_v45, %v269_v33  ;;  %v346_v54 = vmul.f32 %v573_v46, %v309_v44 }
  0xe4   :  { %v177_v47 = vpop.f32.mrf.mxu0  ;;  %v209_v48 = vpop.f32.mrf.mxu1 }
  0xe5   :  { %v336_v57 = vmul.f32 %v259_v34, %v177_v47  ;;  %v344_v58 = vmul.f32 %v299_v42, %v209_v48 }
  0xe6   :  { %v566_v49 = vpop.f32.mrf.mxu0  ;;  %v574_v50 = vpop.f32.mrf.mxu1 }
  0xe7   :  { %v339_v55 = vmul.f32 %v566_v49, %v274_v35  ;;  %v347_v56 = vmul.f32 %v574_v50, %v314_v43 }
  0xe8   :  { %v180_v59 = vpop.f32.mrf.mxu0  ;;  %v212_v60 = vpop.f32.mrf.mxu1 }
  0xe9   :  { %v492_v61 = vpack.c.bf16 %v339_v55, %v338_v53  ;;  %v512_v62 = vpack.c.bf16 %v347_v56, %v346_v54  ;;  %v337_v63 = vmul.f32 %v264_v36, %v180_v59  ;;  %v345_v0 = vmul.f32 %v304_v41, %v212_v60 }
  0xea   :  { %v569_v1 = vpop.f32.mrf.mxu0  ;;  %v577_v2 = vpop.f32.mrf.mxu1 }
  0xeb   :  { %524 = vst [vmem:[%s758_s3 + $0x8] sm:$0xff] %v492_v61   ;;  %528 = vst [vmem:[%s758_s3 + $0x28] sm:$0xff] %v512_v62   ;;  %v487_v3 = vpack.c.bf16 %v337_v63, %v336_v57  ;;  %v507_v4 = vpack.c.bf16 %v345_v0, %v344_v58  ;;  %v342_v11 = vmul.f32 %v569_v1, %v289_v40 }
  0xec   :  { %v193_v5 = vpop.f32.mrf.mxu0  ;;  %v225_v6 = vpop.f32.mrf.mxu1  ;;  %v350_v12 = vmul.f32 %v577_v2, %v329_v8 }
  0xed   :  { %488 = vst [vmem:[%s758_s3] sm:$0xff] %v487_v3   ;;  %527 = vst [vmem:[%s758_s3 + $0x20] sm:$0xff] %v507_v4   ;;  %v340_v15 = vmul.f32 %v279_v38, %v193_v5  ;;  %v348_v16 = vmul.f32 %v319_v52, %v225_v6 }
  0xee   :  { %v570_v9 = vpop.f32.mrf.mxu0  ;;  %v578_v10 = vpop.f32.mrf.mxu1 }
  0xef   :  { %v343_v13 = vmul.f32 %v570_v9, %v294_v39  ;;  %v351_v14 = vmul.f32 %v578_v10, %v334_v7 }
  0xf0   :  { %v196_v17 = vpop.f32.mrf.mxu0  ;;  %v228_v18 = vpop.f32.mrf.mxu1 }
  0xf1   :  { %v502_v19 = vpack.c.bf16 %v343_v13, %v342_v11  ;;  %v522_v20 = vpack.c.bf16 %v351_v14, %v350_v12  ;;  %v341_v21 = vmul.f32 %v284_v37, %v196_v17  ;;  %v349_v22 = vmul.f32 %v324_v51, %v228_v18 }
  0xf3   :  { %526 = vst [vmem:[%s758_s3 + $0x18] sm:$0xff] %v502_v19   ;;  %530 = vst [vmem:[%s758_s3 + $0x38] sm:$0xff] %v522_v20   ;;  %v497_v23 = vpack.c.bf16 %v341_v21, %v340_v15  ;;  %v517_v24 = vpack.c.bf16 %v349_v22, %v348_v16 }
  0xf5   :  { %525 = vst [vmem:[%s758_s3 + $0x10] sm:$0xff] %v497_v23   ;;  %529 = vst [vmem:[%s758_s3 + $0x30] sm:$0xff] %v517_v24  }

// kernel: clutter_classification_gnn.9
= control target key start
LH: loop header
LB: loop body
LE: loop exit
PB: predicated region body
PF: predicated region fallthrough
CT: control target
= control target key end

     0   :  { %v834_v1 = vmov 0   ;;  %s1079_s1 = inlined_call_operand.vmem [shape: bf16[128,128], index: 1, kind: input, shape index: {}]   ;;  %s1080_s0 = inlined_call_operand.vmem [shape: bf16[128,128], index: 0, kind: input, shape index: {}]   ;;  %s1081_s2 = inlined_call_operand.vmem [shape: f32[128,1], index: 2, kind: input, shape index: {}]   ;;  %s1082_s4 = inlined_call_operand.vmem [shape: bf16[128,128], index: 4, kind: input, shape index: {}]   ;;  %s1083_s3 = inlined_call_operand.vmem [shape: f32[1,128], index: 3, kind: input, shape index: {}]   ;;  %s1084_s5 = inlined_call_operand.vmem [shape: bf16[128,128], index: 5, kind: output, shape index: {}]  }
   0x1   :  { %v818_v0 = vld [vmem:[%s1079_s1 + $0x38] sm:$0xff]   ;;  %817 = vset.pattern.permute.xlu1 %v834_v1  ;;  %816 = vset.pattern.permute.xlu0 %v834_v1  ;;  %v819_v2 = vld [vmem:[%s1079_s1 + $0x30] sm:$0xff]   ;;  %v820_v3 = vld [vmem:[%s1079_s1 + $0x28] sm:$0xff]  }
   0x2   :  { %767 = vmatprep.subr.bf16.mxu0 %v818_v0  ;;  %799 = vmatprep.subr.bf16.mxu1 %v818_v0  ;;  %v821_v4 = vld [vmem:[%s1079_s1 + $0x20] sm:$0xff]   ;;  %v822_v7 = vld [vmem:[%s1079_s1 + $0x18] sm:$0xff]   ;;  %v823_v8 = vld [vmem:[%s1079_s1 + $0x10] sm:$0xff]  }
   0x3   :  { %768 = vmatpush3.bf16.msra.mxu0 %v818_v0  ;;  %807 = vmatpush3.bf16.msra.mxu1 %v818_v0  ;;  %v826_v5 = vld [vmem:[%s1080_s0] sm:$0xff]   ;;  %v319_v9 = vld [vmem:[%s1081_s2 + $0x10] sm:$0xff]  ;;  %v320_v11 = vld [vmem:[%s1081_s2 + $0x18] sm:$0xff] }
   0x4   :  { %769 = vmatprep.subr.bf16.mxu0 %v819_v2  ;;  %800 = vmatprep.subr.bf16.mxu1 %v819_v2  ;;  %v827_v6 = vld [vmem:[%s1080_s0 + $0x20] sm:$0xff]   ;;  %v318_v12 = vld [vmem:[%s1081_s2 + $0x8] sm:$0xff]  ;;  %v324_v17 = vld [vmem:[%s1081_s2 + $0x38] sm:$0xff] }
   0x5   :  { %783 = vmatprep.mubr.bf16.mxu0 %v826_v5  ;;  %791 = vmatprep.mubr.bf16.mxu1 %v827_v6  ;;  %v317_v10 = vld [vmem:[%s1081_s2] sm:$0xff]  ;;  %v824_v13 = vld [vmem:[%s1079_s1 + $0x8] sm:$0xff]   ;;  %v323_v18 = vld [vmem:[%s1081_s2 + $0x30] sm:$0xff] }
   0x6   :  { %361 = vperm.xlu1 %817, %v319_v9   ;;  %351 = vperm.xlu0 %816, %v317_v10   ;;  %v322_v14 = vld [vmem:[%s1081_s2 + $0x28] sm:$0xff]  ;;  %v321_v15 = vld [vmem:[%s1081_s2 + $0x20] sm:$0xff]  ;;  %v830_v23 = vld [vmem:[%s1080_s0 + $0x10] sm:$0xff]  }
   0x7   :  { %770 = vmatpush3.bf16.msra.mxu0 %v819_v2  ;;  %808 = vmatpush3.bf16.msra.mxu1 %v819_v2  ;;  %v825_v16 = vld [vmem:[%s1079_s1] sm:$0xff]   ;;  %v828_v19 = vld [vmem:[%s1080_s0 + $0x8] sm:$0xff]   ;;  %v831_v24 = vld [vmem:[%s1080_s0 + $0x30] sm:$0xff]  }
   0x8   :  { %771 = vmatprep.subr.bf16.mxu0 %v820_v3  ;;  %801 = vmatprep.subr.bf16.mxu1 %v820_v3  ;;  %v829_v20 = vld [vmem:[%s1080_s0 + $0x28] sm:$0xff]   ;;  %v325_v22 = vld [vmem:[%s1081_s2 + $0x40] sm:$0xff]  ;;  %v328_v25 = vld [vmem:[%s1081_s2 + $0x58] sm:$0xff] }
   0x9   :  { %v326_v21 = vld [vmem:[%s1081_s2 + $0x48] sm:$0xff]  ;;  %v327_v26 = vld [vmem:[%s1081_s2 + $0x50] sm:$0xff]  ;;  %v832_v27 = vld [vmem:[%s1080_s0 + $0x18] sm:$0xff]  }
   0xa   :  { %366 = vperm.xlu1 %817, %v320_v11   ;;  %356 = vperm.xlu0 %816, %v318_v12   ;;  %v833_v28 = vld [vmem:[%s1080_s0 + $0x38] sm:$0xff]   ;;  %v330_v29 = vld [vmem:[%s1081_s2 + $0x68] sm:$0xff]  ;;  %v329_v30 = vld [vmem:[%s1081_s2 + $0x60] sm:$0xff] }
   0xb   :  { %772 = vmatpush3.bf16.msra.mxu0 %v820_v3  ;;  %809 = vmatpush3.bf16.msra.mxu1 %v820_v3  ;;  %v332_v31 = vld [vmem:[%s1081_s2 + $0x78] sm:$0xff]  ;;  %v331_v32 = vld [vmem:[%s1081_s2 + $0x70] sm:$0xff]  ;;  %v970_v44 = vld [vmem:[%s1082_s4 + $0x8] sm:$0xff]  }
   0xc   :  { %773 = vmatprep.subr.bf16.mxu0 %v821_v4  ;;  %802 = vmatprep.subr.bf16.mxu1 %v821_v4  ;;  %v975_v45 = vld [vmem:[%s1082_s4 + $0x28] sm:$0xff]   ;;  %v980_v47 = vld [vmem:[%s1083_s3] ss:$0 sm:$0xff]  ;;  %v671_v54 = vunpack.c.l.bf16 %v970_v44  ;;  %v999_v63 = vld [vmem:[%s1082_s4 + $0x18] sm:$0xff]  }
   0xd   :  { %v985_v52 = vld [vmem:[%s1082_s4] sm:$0xff]   ;;  %v687_v55 = vunpack.c.l.bf16 %v975_v45  ;;  %v1004_v0 = vld [vmem:[%s1082_s4 + $0x38] sm:$0xff]   ;;  %v688_v6 = vunpack.c.h.bf16 %v975_v45 }
   0xe   :  { %376 = vperm.xlu1 %817, %v322_v14   ;;  %371 = vperm.xlu0 %816, %v321_v15   ;;  %v990_v53 = vld [vmem:[%s1082_s4 + $0x20] sm:$0xff]   ;;  %v667_v1 = vunpack.c.l.bf16 %v985_v52  ;;  %v668_v11 = vunpack.c.h.bf16 %v985_v52 }
   0xf   :  { %774 = vmatpush3.bf16.msra.mxu0 %v821_v4  ;;  %810 = vmatpush3.bf16.msra.mxu1 %v821_v4  ;;  %v683_v2 = vunpack.c.l.bf16 %v990_v53  ;;  %v672_v4 = vunpack.c.h.bf16 %v970_v44  ;;  %v684_v12 = vunpack.c.h.bf16 %v990_v53 }
  0x10   :  { %775 = vmatprep.subr.bf16.mxu0 %v822_v7  ;;  %803 = vmatprep.subr.bf16.mxu1 %v822_v7 }
  0x12   :  { %386 = vperm.xlu1 %817, %v324_v17   ;;  %381 = vperm.xlu0 %816, %v323_v18   ;;  %v679_v17 = vunpack.c.l.bf16 %v999_v63  ;;  %v695_v18 = vunpack.c.l.bf16 %v1004_v0 }
  0x13   :  { %776 = vmatpush3.bf16.msra.mxu0 %v822_v7  ;;  %811 = vmatpush3.bf16.msra.mxu1 %v822_v7  ;;  %v1013_v7 = vld [vmem:[%s1082_s4 + $0x10] sm:$0xff]  }
  0x14   :  { %777 = vmatprep.subr.bf16.mxu0 %v823_v8  ;;  %804 = vmatprep.subr.bf16.mxu1 %v823_v8 }
  0x16   :  { %396 = vperm.xlu1 %817, %v326_v21   ;;  %391 = vperm.xlu0 %816, %v325_v22   ;;  %v675_v22 = vunpack.c.l.bf16 %v1013_v7 }
  0x17   :  { %778 = vmatpush3.bf16.msra.mxu0 %v823_v8  ;;  %812 = vmatpush3.bf16.msra.mxu1 %v823_v8  ;;  %v1018_v8 = vld [vmem:[%s1082_s4 + $0x30] sm:$0xff]  }
  0x18   :  { %779 = vmatprep.subr.bf16.mxu0 %v824_v13  ;;  %805 = vmatprep.subr.bf16.mxu1 %v824_v13 }
  0x1a   :  { %406 = vperm.xlu1 %817, %v328_v25   ;;  %401 = vperm.xlu0 %816, %v327_v26  }
  0x1b   :  { %780 = vmatpush3.bf16.msra.mxu0 %v824_v13  ;;  %813 = vmatpush3.bf16.msra.mxu1 %v824_v13 }
  0x1c   :  { %781 = vmatprep.subr.bf16.mxu0 %v825_v16  ;;  %806 = vmatprep.subr.bf16.mxu1 %v825_v16 }
  0x1e   :  { %416 = vperm.xlu1 %817, %v330_v29   ;;  %411 = vperm.xlu0 %816, %v329_v30  }
  0x1f   :  { %782 = vmatpush3.bf16.msra.mxu0 %v825_v16  ;;  %814 = vmatpush3.bf16.msra.mxu1 %v825_v16 }
  0x22   :  { %784 = vmatmul.mubr.bf16.vlgmr.msra.gmra.mxu0 %v828_v19  ;;  %792 = vmatmul.mubr.bf16.vlgmr.msra.gmra.mxu1 %v829_v20 }
  0x23   :  { %787 = vmatprep.mubr.bf16.mxu0 %v830_v23  ;;  %795 = vmatprep.mubr.bf16.mxu1 %v831_v24  ;;  %v691_v23 = vunpack.c.l.bf16 %v1018_v8 }
  0x24   :  { %426 = vperm.xlu1 %817, %v332_v31   ;;  %421 = vperm.xlu0 %816, %v331_v32  }
  0x2a   :  { %788 = vmatmul.mubr.bf16.gmra.mxu0 %v832_v27  ;;  %796 = vmatmul.mubr.bf16.gmra.mxu1 %v833_v28 }
  0x81   :  { %v352_v33 = vpop.permute.xlu0 %351  ;;  %v362_v35 = vpop.permute.xlu1 %361 }
  0x85   :  { %v357_v34 = vpop.permute.xlu0 %356  ;;  %v367_v37 = vpop.permute.xlu1 %366 }
  0x89   :  { %v961_v36 = vpop.permute.xlu0 %371  ;;  %v963_v39 = vpop.permute.xlu1 %376 }
  0x8d   :  { %v382_v38 = vpop.permute.xlu0 %381  ;;  %v965_v41 = vpop.permute.xlu1 %386 }
  0x91   :  { %v392_v40 = vpop.permute.xlu0 %391  ;;  %v397_v43 = vpop.permute.xlu1 %396 }
  0x95   :  { %v402_v42 = vpop.permute.xlu0 %401  ;;  %v407_v58 = vpop.permute.xlu1 %406 }
  0x99   :  { %v412_v49 = vpop.permute.xlu0 %411  ;;  %v417_v30 = vpop.permute.xlu1 %416 }
  0x9f   :  { %v422_v19 = vpop.permute.xlu0 %421 }
  0xe2   :  { %v785_v46 = vpop.f32.mrf.mxu0  ;;  %v793_v48 = vpop.f32.mrf.mxu1 }
  0xe3   :  { %v431_v50 = vmul.f32 %v785_v46, %v362_v35  ;;  %v439_v51 = vmul.f32 %v793_v48, %v402_v42 }
  0xe4   :  { %v219_v56 = vpop.f32.mrf.mxu0  ;;  %v251_v57 = vpop.f32.mrf.mxu1 }
  0xe5   :  { %v454_v59 = vadd.f32 %v980_v47, %v431_v50  ;;  %v462_v60 = vadd.f32 %v980_v47, %v439_v51  ;;  %v429_v61 = vmul.f32 %v352_v33, %v219_v56  ;;  %v437_v62 = vmul.f32 %v392_v40, %v251_v57 }
  0xe6   :  { %v786_v3 = vpop.f32.mrf.mxu0  ;;  %v794_v5 = vpop.f32.mrf.mxu1 }
  0xe7   :  { %v452_v9 = vadd.f32 %v980_v47, %v429_v61  ;;  %v460_v10 = vadd.f32 %v980_v47, %v437_v62  ;;  %v432_v13 = vmul.f32 %v786_v3, %v367_v37  ;;  %v440_v14 = vmul.f32 %v794_v5, %v407_v58 }
  0xe8   :  { %v222_v15 = vpop.f32.mrf.mxu0  ;;  %v254_v16 = vpop.f32.mrf.mxu1  ;;  %v470_v20 = vmax.f32 %v454_v59, 0.0  ;;  %v478_v21 = vmax.f32 %v462_v60, 0.0 }
  0xe9   :  { %v455_v24 = vadd.f32 %v980_v47, %v432_v13  ;;  %v463_v25 = vadd.f32 %v980_v47, %v440_v14  ;;  %v430_v26 = vmul.f32 %v357_v34, %v222_v15  ;;  %v438_v27 = vmul.f32 %v397_v43, %v254_v16 }
  0xea   :  { %v789_v28 = vpop.f32.mrf.mxu0  ;;  %v797_v29 = vpop.f32.mrf.mxu1  ;;  %v468_v31 = vmax.f32 %v452_v9, 0.0  ;;  %v476_v32 = vmax.f32 %v460_v10, 0.0  ;;  %v518_v48 = vadd.f32 %v671_v54, %v470_v20  ;;  %v526_v50 = vadd.f32 %v687_v55, %v478_v21 }
  0xeb   :  { %v435_v33 = vmul.f32 %v789_v28, %v382_v38  ;;  %v443_v35 = vmul.f32 %v797_v29, %v422_v19  ;;  %v471_v37 = vmax.f32 %v455_v24, 0.0  ;;  %v479_v40 = vmax.f32 %v463_v25, 0.0 }
  0xec   :  { %v453_v42 = vadd.f32 %v980_v47, %v430_v26  ;;  %v461_v44 = vadd.f32 %v980_v47, %v438_v27  ;;  %v235_v45 = vpop.f32.mrf.mxu0  ;;  %v267_v46 = vpop.f32.mrf.mxu1  ;;  %v516_v58 = vadd.f32 %v667_v1, %v468_v31  ;;  %v524_v59 = vadd.f32 %v683_v2, %v476_v32 }
  0xed   :  { %v433_v34 = vmul.f32 %v961_v36, %v235_v45  ;;  %v441_v43 = vmul.f32 %v412_v49, %v267_v46  ;;  %v519_v51 = vadd.f32 %v672_v4, %v471_v37  ;;  %v527_v52 = vadd.f32 %v688_v6, %v479_v40  ;;  %v427_v36 = vpop.permute.xlu1 %426 }
  0xee   :  { %v469_v53 = vmax.f32 %v453_v42, 0.0  ;;  %v477_v56 = vmax.f32 %v461_v44, 0.0  ;;  %v790_v57 = vpop.f32.mrf.mxu0  ;;  %v798_v38 = vpop.f32.mrf.mxu1  ;;  %v458_v60 = vadd.f32 %v980_v47, %v435_v33  ;;  %v466_v61 = vadd.f32 %v980_v47, %v443_v35 }
  0xef   :  { %v705_v62 = vpack.c.bf16 %v519_v51, %v518_v48  ;;  %v725_v3 = vpack.c.bf16 %v527_v52, %v526_v50  ;;  %v456_v49 = vadd.f32 %v980_v47, %v433_v34  ;;  %v464_v4 = vadd.f32 %v980_v47, %v441_v43 }
  0xf0   :  { %v517_v5 = vadd.f32 %v668_v11, %v469_v53  ;;  %v525_v54 = vadd.f32 %v684_v12, %v477_v56  ;;  %v238_v55 = vpop.f32.mrf.mxu0  ;;  %v270_v9 = vpop.f32.mrf.mxu1  ;;  %v680_v6 = vunpack.c.h.bf16 %v999_v63  ;;  %v696_v1 = vunpack.c.h.bf16 %v1004_v0 }
  0xf1   :  { %744 = vst [vmem:[%s1084_s5 + $0x8] sm:$0xff] %v705_v62   ;;  %748 = vst [vmem:[%s1084_s5 + $0x28] sm:$0xff] %v725_v3   ;;  %v436_v11 = vmul.f32 %v790_v57, %v965_v41  ;;  %v444_v12 = vmul.f32 %v798_v38, %v427_v36  ;;  %v434_v13 = vmul.f32 %v963_v39, %v238_v55  ;;  %v676_v14 = vunpack.c.h.bf16 %v1013_v7 }
  0xf2   :  { %v700_v2 = vpack.c.bf16 %v517_v5, %v516_v58  ;;  %v720_v10 = vpack.c.bf16 %v525_v54, %v524_v59  ;;  %v442_v15 = vmul.f32 %v417_v30, %v270_v9  ;;  %v692_v16 = vunpack.c.h.bf16 %v1018_v8 }
  0xf3   :  { %v474_v19 = vmax.f32 %v458_v60, 0.0  ;;  %v482_v20 = vmax.f32 %v466_v61, 0.0  ;;  %v459_v41 = vadd.f32 %v980_v47, %v436_v11  ;;  %v467_v21 = vadd.f32 %v980_v47, %v444_v12 }
  0xf4   :  { %701 = vst [vmem:[%s1084_s5] sm:$0xff] %v700_v2   ;;  %747 = vst [vmem:[%s1084_s5 + $0x20] sm:$0xff] %v720_v10   ;;  %v472_v39 = vmax.f32 %v456_v49, 0.0  ;;  %v480_v24 = vmax.f32 %v464_v4, 0.0  ;;  %v457_v25 = vadd.f32 %v980_v47, %v434_v13  ;;  %v465_v26 = vadd.f32 %v980_v47, %v442_v15 }
  0xf5   :  { %v475_v27 = vmax.f32 %v459_v41, 0.0  ;;  %v483_v28 = vmax.f32 %v467_v21, 0.0  ;;  %v522_v31 = vadd.f32 %v679_v17, %v474_v19  ;;  %v530_v32 = vadd.f32 %v695_v18, %v482_v20 }
  0xf6   :  { %v473_v29 = vmax.f32 %v457_v25, 0.0  ;;  %v481_v30 = vmax.f32 %v465_v26, 0.0  ;;  %v520_v37 = vadd.f32 %v675_v22, %v472_v39  ;;  %v528_v40 = vadd.f32 %v691_v23, %v480_v24 }
  0xf7   :  { %v523_v33 = vadd.f32 %v680_v6, %v475_v27  ;;  %v531_v35 = vadd.f32 %v696_v1, %v483_v28 }
  0xf8   :  { %v521_v42 = vadd.f32 %v676_v14, %v473_v29  ;;  %v529_v47 = vadd.f32 %v692_v16, %v481_v30 }
  0xf9   :  { %v715_v44 = vpack.c.bf16 %v523_v33, %v522_v31  ;;  %v735_v45 = vpack.c.bf16 %v531_v35, %v530_v32 }
  0xfa   :  { %v710_v46 = vpack.c.bf16 %v521_v42, %v520_v37  ;;  %v730_v48 = vpack.c.bf16 %v529_v47, %v528_v40 }
  0xfb   :  { %746 = vst [vmem:[%s1084_s5 + $0x18] sm:$0xff] %v715_v44   ;;  %750 = vst [vmem:[%s1084_s5 + $0x38] sm:$0xff] %v735_v45  }
  0xfc   :  { %745 = vst [vmem:[%s1084_s5 + $0x10] sm:$0xff] %v710_v46   ;;  %749 = vst [vmem:[%s1084_s5 + $0x30] sm:$0xff] %v730_v48  }

// kernel: clutter_classification_gnn.11
= control target key start
LH: loop header
LB: loop body
LE: loop exit
PB: predicated region body
PF: predicated region fallthrough
CT: control target
= control target key end

     0   :  { %v1533_v1 = vmov 0   ;;  %s1987_s1 = inlined_call_operand.vmem [shape: bf16[128,128], index: 1, kind: input, shape index: {}]   ;;  %s1988_s0 = inlined_call_operand.vmem [shape: bf16[128,128], index: 0, kind: input, shape index: {}]   ;;  %s1989_s2 = inlined_call_operand.vmem [shape: f32[128,1], index: 2, kind: input, shape index: {}]   ;;  %s1990_s5 = inlined_call_operand.vmem [shape: bf16[128,128], index: 5, kind: input, shape index: {}]   ;;  %s1991_s3 = inlined_call_operand.vmem [shape: f32[1,128], index: 3, kind: input, shape index: {}]   ;;  %s1992_s4 = inlined_call_operand.vmem [shape: bf16[128,128], index: 4, kind: input, shape index: {}]   ;;  %s1993_s6 = inlined_call_operand.vmem [shape: f32[1,128], index: 6, kind: input, shape index: {}]   ;;  %s1994_s7 = inlined_call_operand.vmem [shape: f32[1,128], index: 7, kind: input, shape index: {}]   ;;  %s1995_s10 = inlined_call_operand.vmem [shape: bf16[128,128], index: 10, kind: input, shape index: {}]   ;;  %s1996_s8 = inlined_call_operand.<no memory space> [shape: f32[1], index: 8, kind: input, shape index: {}]   ;;  %s1997_s9 = inlined_call_operand.vmem [shape: f32[1,128], index: 9, kind: input, shape index: {}]   ;;  %s1998_s11 = inlined_call_operand.vmem [shape: f32[1,128], index: 11, kind: input, shape index: {}]   ;;  %s1999_s12 = inlined_call_operand.vmem [shape: f32[128,128], index: 12, kind: output, shape index: {}]  }
   0x1   :  { %v1437_v0 = vld [vmem:[%s1987_s1 + $0x38] sm:$0xff]   ;;  %1435 = vset.pattern.permute.xlu0 %v1533_v1  ;;  %1436 = vset.pattern.permute.xlu1 %v1533_v1  ;;  %v1438_v2 = vld [vmem:[%s1987_s1 + $0x30] sm:$0xff]   ;;  %v1439_v3 = vld [vmem:[%s1987_s1 + $0x28] sm:$0xff]  }
   0x2   :  { %1322 = vmatprep.subr.bf16.mxu0 %v1437_v0  ;;  %v1440_v4 = vld [vmem:[%s1987_s1 + $0x20] sm:$0xff]   ;;  %v1441_v6 = vld [vmem:[%s1987_s1 + $0x18] sm:$0xff]   ;;  %v1442_v7 = vld [vmem:[%s1987_s1 + $0x10] sm:$0xff]  }
   0x3   :  { %1323 = vmatpush3.bf16.msra.mxu0 %v1437_v0  ;;  %v1445_v5 = vld [vmem:[%s1988_s0] sm:$0xff]   ;;  %v341_v9 = vld [vmem:[%s1989_s2 + $0x10] sm:$0xff]  ;;  %v340_v10 = vld [vmem:[%s1989_s2 + $0x8] sm:$0xff] }
   0x4   :  { %1324 = vmatprep.subr.bf16.mxu0 %v1438_v2  ;;  %1338 = vmatprep.mubr.bf16.mxu0 %v1445_v5  ;;  %v339_v8 = vld [vmem:[%s1989_s2] sm:$0xff]  ;;  %v342_v11 = vld [vmem:[%s1989_s2 + $0x18] sm:$0xff]  ;;  %v1443_v12 = vld [vmem:[%s1987_s1 + $0x8] sm:$0xff]  }
   0x5   :  { %373 = vperm.xlu0 %1435, %v339_v8   ;;  %383 = vperm.xlu1 %1436, %v341_v9   ;;  %v343_v13 = vld [vmem:[%s1989_s2 + $0x20] sm:$0xff]  ;;  %v344_v14 = vld [vmem:[%s1989_s2 + $0x28] sm:$0xff]  ;;  %v1453_v16 = vld [vmem:[%s1990_s5 + $0x38] sm:$0xff]  }
   0x6   :  { %v1444_v15 = vld [vmem:[%s1987_s1] sm:$0xff]   ;;  %v345_v17 = vld [vmem:[%s1989_s2 + $0x30] sm:$0xff]  ;;  %v346_v18 = vld [vmem:[%s1989_s2 + $0x38] sm:$0xff]  ;;  %1354 = vmatprep.subr.bf16.mxu1 %v1453_v16 }
   0x7   :  { %1325 = vmatpush3.bf16.msra.mxu0 %v1438_v2  ;;  %v1454_v19 = vld [vmem:[%s1990_s5 + $0x30] sm:$0xff]   ;;  %1355 = vmatpush3.bf16.msra.mxu1 %v1453_v16  ;;  %v1455_v20 = vld [vmem:[%s1990_s5 + $0x28] sm:$0xff]   ;;  %v347_v22 = vld [vmem:[%s1989_s2 + $0x40] sm:$0xff] }
   0x8   :  { %1326 = vmatprep.subr.bf16.mxu0 %v1439_v3  ;;  %1356 = vmatprep.subr.bf16.mxu1 %v1454_v19  ;;  %v1446_v21 = vld [vmem:[%s1988_s0 + $0x8] sm:$0xff]   ;;  %v1447_v24 = vld [vmem:[%s1988_s0 + $0x10] sm:$0xff]   ;;  %v1456_v25 = vld [vmem:[%s1990_s5 + $0x20] sm:$0xff]  }
   0x9   :  { %378 = vperm.xlu0 %1435, %v340_v10   ;;  %388 = vperm.xlu1 %1436, %v342_v11   ;;  %v348_v23 = vld [vmem:[%s1989_s2 + $0x48] sm:$0xff]  ;;  %v349_v26 = vld [vmem:[%s1989_s2 + $0x50] sm:$0xff]  ;;  %v350_v27 = vld [vmem:[%s1989_s2 + $0x58] sm:$0xff] }
   0xa   :  { %v1448_v28 = vld [vmem:[%s1988_s0 + $0x18] sm:$0xff]   ;;  %v351_v29 = vld [vmem:[%s1989_s2 + $0x60] sm:$0xff]  ;;  %v352_v30 = vld [vmem:[%s1989_s2 + $0x68] sm:$0xff] }
   0xb   :  { %1327 = vmatpush3.bf16.msra.mxu0 %v1439_v3  ;;  %1357 = vmatpush3.bf16.msra.mxu1 %v1454_v19  ;;  %v1449_v31 = vld [vmem:[%s1988_s0 + $0x20] sm:$0xff]   ;;  %v353_v32 = vld [vmem:[%s1989_s2 + $0x70] sm:$0xff]  ;;  %v354_v33 = vld [vmem:[%s1989_s2 + $0x78] sm:$0xff] }
   0xc   :  { %1328 = vmatprep.subr.bf16.mxu0 %v1440_v4  ;;  %1358 = vmatprep.subr.bf16.mxu1 %v1455_v20  ;;  %v1450_v34 = vld [vmem:[%s1988_s0 + $0x28] sm:$0xff]   ;;  %v1451_v35 = vld [vmem:[%s1988_s0 + $0x30] sm:$0xff]   ;;  %v1452_v36 = vld [vmem:[%s1988_s0 + $0x38] sm:$0xff]  }
   0xd   :  { %393 = vperm.xlu0 %1435, %v343_v13   ;;  %398 = vperm.xlu1 %1436, %v344_v14   ;;  %v1457_v37 = vld [vmem:[%s1990_s5 + $0x18] sm:$0xff]   ;;  %v1458_v38 = vld [vmem:[%s1990_s5 + $0x10] sm:$0xff]   ;;  %v1459_v39 = vld [vmem:[%s1990_s5 + $0x8] sm:$0xff]  }
   0xe   :  { %v1460_v40 = vld [vmem:[%s1990_s5] sm:$0xff]   ;;  %v1267_v59 = vld [vmem:[%s1992_s4 + $0x8] sm:$0xff]  }
   0xf   :  { %1329 = vmatpush3.bf16.msra.mxu0 %v1440_v4  ;;  %1359 = vmatpush3.bf16.msra.mxu1 %v1455_v20  ;;  %v1722_v53 = vld [vmem:[%s1991_s3] ss:$0 sm:$0xff]  ;;  %v1242_v1 = vunpack.c.h.bf16 %v1267_v59 }
  0x10   :  { %1330 = vmatprep.subr.bf16.mxu0 %v1441_v6  ;;  %1360 = vmatprep.subr.bf16.mxu1 %v1456_v25  ;;  %v1236_v62 = vld [vmem:[%s1992_s4] sm:$0xff]  }
  0x11   :  { %403 = vperm.xlu0 %1435, %v345_v17   ;;  %408 = vperm.xlu1 %1436, %v346_v18   ;;  %v1238_v4 = vunpack.c.h.bf16 %v1236_v62  ;;  %v1237_v9 = vunpack.c.l.bf16 %v1236_v62 }
  0x13   :  { %1331 = vmatpush3.bf16.msra.mxu0 %v1441_v6  ;;  %1361 = vmatpush3.bf16.msra.mxu1 %v1456_v25  ;;  %v1241_v6 = vunpack.c.l.bf16 %v1267_v59  ;;  %v1268_v25 = vld [vmem:[%s1992_s4 + $0x10] sm:$0xff]  }
  0x14   :  { %1332 = vmatprep.subr.bf16.mxu0 %v1442_v7  ;;  %1362 = vmatprep.subr.bf16.mxu1 %v1457_v37 }
  0x15   :  { %413 = vperm.xlu0 %1435, %v347_v22   ;;  %418 = vperm.xlu1 %1436, %v348_v23  }
  0x17   :  { %1333 = vmatpush3.bf16.msra.mxu0 %v1442_v7  ;;  %1363 = vmatpush3.bf16.msra.mxu1 %v1457_v37  ;;  %v1245_v37 = vunpack.c.l.bf16 %v1268_v25 }
  0x18   :  { %1334 = vmatprep.subr.bf16.mxu0 %v1443_v12  ;;  %1364 = vmatprep.subr.bf16.mxu1 %v1458_v38 }
  0x19   :  { %423 = vperm.xlu0 %1435, %v349_v26   ;;  %428 = vperm.xlu1 %1436, %v350_v27  }
  0x1b   :  { %1335 = vmatpush3.bf16.msra.mxu0 %v1443_v12  ;;  %1365 = vmatpush3.bf16.msra.mxu1 %v1458_v38 }
  0x1c   :  { %1336 = vmatprep.subr.bf16.mxu0 %v1444_v15  ;;  %1366 = vmatprep.subr.bf16.mxu1 %v1459_v39 }
  0x1d   :  { %433 = vperm.xlu0 %1435, %v351_v29   ;;  %438 = vperm.xlu1 %1436, %v352_v30  }
  0x1f   :  { %1337 = vmatpush3.bf16.msra.mxu0 %v1444_v15  ;;  %1367 = vmatpush3.bf16.msra.mxu1 %v1459_v39 }
  0x20   :  { %1368 = vmatprep.subr.bf16.mxu1 %v1460_v40 }
  0x21   :  { %443 = vperm.xlu0 %1435, %v353_v32   ;;  %448 = vperm.xlu1 %1436, %v354_v33  }
  0x22   :  { %1339 = vmatmul.mubr.bf16.vlgmr.msra.gmra.mxu0 %v1446_v21 }
  0x23   :  { %1342 = vmatprep.mubr.bf16.mxu0 %v1447_v24  ;;  %1369 = vmatpush3.bf16.msra.mxu1 %v1460_v40  ;;  %v1269_v24 = vld [vmem:[%s1992_s4 + $0x18] sm:$0xff]  }
  0x24   :  { %v1250_v29 = vunpack.c.h.bf16 %v1269_v24 }
  0x2a   :  { %1343 = vmatmul.mubr.bf16.gmra.mxu0 %v1448_v28 }
  0x2b   :  { %1346 = vmatprep.mubr.bf16.mxu0 %v1449_v31 }
  0x32   :  { %1347 = vmatmul.mubr.bf16.gmra.mxu0 %v1450_v34  ;;  %v1246_v34 = vunpack.c.h.bf16 %v1268_v25 }
  0x33   :  { %1350 = vmatprep.mubr.bf16.mxu0 %v1451_v35 }
  0x3a   :  { %1351 = vmatmul.mubr.bf16.gmra.mxu0 %v1452_v36  ;;  %v1249_v36 = vunpack.c.l.bf16 %v1269_v24 }
  0x80   :  { %v374_v41 = vpop.permute.xlu0 %373  ;;  %v384_v42 = vpop.permute.xlu1 %383 }
  0x84   :  { %v379_v43 = vpop.permute.xlu0 %378  ;;  %v389_v44 = vpop.permute.xlu1 %388 }
  0x88   :  { %v394_v45 = vpop.permute.xlu0 %393  ;;  %v399_v46 = vpop.permute.xlu1 %398 }
  0x8c   :  { %v404_v48 = vpop.permute.xlu0 %403  ;;  %v409_v52 = vpop.permute.xlu1 %408 }
  0x90   :  { %v414_v63 = vpop.permute.xlu0 %413  ;;  %v419_v5 = vpop.permute.xlu1 %418 }
  0x94   :  { %v424_v18 = vpop.permute.xlu0 %423  ;;  %v429_v28 = vpop.permute.xlu1 %428 }
  0xe2   :  { %v1340_v47 = vpop.f32.mrf.mxu0 }
  0xe3   :  { %v453_v50 = vmul.f32 %v1340_v47, %v384_v42 }
  0xe4   :  { %v241_v49 = vpop.f32.mrf.mxu0 }
  0xe5   :  { %v451_v51 = vmul.f32 %v374_v41, %v241_v49  ;;  %v476_v58 = vadd.f32 %v1722_v53, %v453_v50  ;;  %v439_v49 = vpop.permute.xlu1 %438 }
  0xe6   :  { %v1341_v54 = vpop.f32.mrf.mxu0 }
  0xe7   :  { %v454_v55 = vmul.f32 %v1341_v54, %v389_v44  ;;  %v474_v56 = vadd.f32 %v1722_v53, %v451_v51  ;;  %v524_v10 = vmax.f32 %v476_v58, 0.0  ;;  %v434_v44 = vpop.permute.xlu0 %433 }
  0xe8   :  { %v244_v57 = vpop.f32.mrf.mxu0 }
  0xe9   :  { %v477_v60 = vadd.f32 %v1722_v53, %v454_v55  ;;  %v452_v61 = vmul.f32 %v379_v43, %v244_v57  ;;  %v522_v7 = vmax.f32 %v474_v56, 0.0  ;;  %v540_v22 = vadd.f32 %v1241_v6, %v524_v10  ;;  %v1271_v56 = vld [vmem:[%s1992_s4 + $0x28] sm:$0xff]   ;;  %v1270_v57 = vld [vmem:[%s1992_s4 + $0x20] sm:$0xff]  }
  0xea   :  { %v1344_v0 = vpop.f32.mrf.mxu0  ;;  %v1253_v6 = vunpack.c.l.bf16 %v1270_v57 }
  0xeb   :  { %v525_v2 = vmax.f32 %v477_v60, 0.0  ;;  %v475_v3 = vadd.f32 %v1722_v53, %v452_v61  ;;  %v457_v12 = vmul.f32 %v1344_v0, %v404_v48  ;;  %v538_v21 = vadd.f32 %v1237_v9, %v522_v7 }
  0xec   :  { %v257_v8 = vpop.f32.mrf.mxu0  ;;  %v1258_v60 = vunpack.c.h.bf16 %v1271_v56 }
  0xed   :  { %v523_v11 = vmax.f32 %v475_v3, 0.0  ;;  %v455_v13 = vmul.f32 %v394_v45, %v257_v8  ;;  %v541_v15 = vadd.f32 %v1242_v1, %v525_v2  ;;  %v480_v23 = vadd.f32 %v1722_v53, %v457_v12  ;;  %v444_v3 = vpop.permute.xlu0 %443 }
  0xee   :  { %v1345_v14 = vpop.f32.mrf.mxu0  ;;  %v1254_v1 = vunpack.c.h.bf16 %v1270_v57 }
  0xef   :  { %v458_v16 = vmul.f32 %v1345_v14, %v409_v52  ;;  %v539_v17 = vadd.f32 %v1238_v4, %v523_v11  ;;  %v478_v19 = vadd.f32 %v1722_v53, %v455_v13  ;;  %v555_v35 = vpack.c.bf16 %v541_v15, %v540_v22 }
  0xf0   :  { %v260_v20 = vpop.f32.mrf.mxu0  ;;  %v528_v40 = vmax.f32 %v480_v23, 0.0  ;;  %v1257_v4 = vunpack.c.l.bf16 %v1271_v56  ;;  %v1273_v23 = vld [vmem:[%s1992_s4 + $0x38] sm:$0xff]  }
  0xf1   :  { %v481_v26 = vadd.f32 %v1722_v53, %v458_v16  ;;  %v456_v27 = vmul.f32 %v399_v46, %v260_v20  ;;  %v554_v31 = vpack.c.bf16 %v539_v17, %v538_v21  ;;  %v526_v38 = vmax.f32 %v478_v19, 0.0  ;;  %v1272_v17 = vld [vmem:[%s1992_s4 + $0x30] sm:$0xff]  }
  0xf2   :  { %v1348_v30 = vpop.f32.mrf.mxu0  ;;  %v544_v54 = vadd.f32 %v1249_v36, %v528_v40 }
  0xf3   :  { %v529_v32 = vmax.f32 %v481_v26, 0.0  ;;  %v479_v33 = vadd.f32 %v1722_v53, %v456_v27  ;;  %1370 = vmatprep.mubr.bf16.mxu1 %v554_v31  ;;  %v461_v42 = vmul.f32 %v1348_v30, %v424_v18  ;;  %v542_v50 = vadd.f32 %v1245_v37, %v526_v38 }
  0xf4   :  { %v273_v39 = vpop.f32.mrf.mxu0  ;;  %1371 = vmatmul.mubr.bf16.vlgmr.msra.gmra.mxu1 %v555_v35  ;;  %v1261_v26 = vunpack.c.l.bf16 %v1272_v17  ;;  %v1266_v27 = vunpack.c.h.bf16 %v1273_v23 }
  0xf5   :  { %v527_v41 = vmax.f32 %v479_v33, 0.0  ;;  %v459_v43 = vmul.f32 %v414_v63, %v273_v39  ;;  %v545_v46 = vadd.f32 %v1250_v29, %v529_v32  ;;  %v484_v55 = vadd.f32 %v1722_v53, %v461_v42 }
  0xf6   :  { %v1349_v45 = vpop.f32.mrf.mxu0 }
  0xf7   :  { %v543_v47 = vadd.f32 %v1246_v34, %v527_v41  ;;  %v462_v48 = vmul.f32 %v1349_v45, %v429_v28  ;;  %v482_v51 = vadd.f32 %v1722_v53, %v459_v43  ;;  %v557_v2 = vpack.c.bf16 %v545_v46, %v544_v54  ;;  %v1767_v43 = vld [vmem:[%s1993_s6] ss:$0 sm:$0xff] }
  0xf8   :  { %v276_v52 = vpop.f32.mrf.mxu0  ;;  %v532_v9 = vmax.f32 %v484_v55, 0.0  ;;  %v1262_v28 = vunpack.c.h.bf16 %v1272_v17  ;;  %v1265_v34 = vunpack.c.l.bf16 %v1273_v23  ;;  %v1778_v46 = vld [vmem:[%s1994_s7] ss:$0 sm:$0xff] }
  0xf9   :  { %v485_v58 = vadd.f32 %v1722_v53, %v462_v48  ;;  %v460_v59 = vmul.f32 %v419_v5, %v276_v52  ;;  %v556_v62 = vpack.c.bf16 %v543_v47, %v542_v50  ;;  %v530_v7 = vmax.f32 %v482_v51, 0.0  ;;  %v449_v5 = vpop.permute.xlu1 %448 }
  0xfa   :  { %v1352_v61 = vpop.f32.mrf.mxu0  ;;  %v548_v21 = vadd.f32 %v1257_v4, %v532_v9 }
  0xfb   :  { %v533_v63 = vmax.f32 %v485_v58, 0.0  ;;  %v483_v0 = vadd.f32 %v1722_v53, %v460_v59  ;;  %1374 = vmatprep.mubr.bf16.mxu1 %v556_v62  ;;  %v465_v11 = vmul.f32 %v1352_v61, %v444_v3  ;;  %v546_v19 = vadd.f32 %v1253_v6, %v530_v7 }
  0xfc   :  { %v289_v8 = vpop.f32.mrf.mxu0  ;;  %1375 = vmatmul.mubr.bf16.gmra.mxu1 %v557_v2 }
  0xfd   :  { %v531_v10 = vmax.f32 %v483_v0, 0.0  ;;  %v463_v12 = vmul.f32 %v434_v44, %v289_v8  ;;  %v549_v14 = vadd.f32 %v1258_v60, %v533_v63  ;;  %v488_v22 = vadd.f32 %v1722_v53, %v465_v11 }
  0xfe   :  { %v1353_v13 = vpop.f32.mrf.mxu0 }
  0xff   :  { %v547_v15 = vadd.f32 %v1254_v1, %v531_v10  ;;  %v486_v16 = vadd.f32 %v1722_v53, %v463_v12  ;;  %v466_v18 = vmul.f32 %v1353_v13, %v449_v5  ;;  %v559_v33 = vpack.c.bf16 %v549_v14, %v548_v21 }
 0x100   :  { %v292_v20 = vpop.f32.mrf.mxu0  ;;  %v536_v35 = vmax.f32 %v488_v22, 0.0 }
 0x101   :  { %v489_v24 = vadd.f32 %v1722_v53, %v466_v18  ;;  %v464_v25 = vmul.f32 %v439_v49, %v292_v20  ;;  %v558_v29 = vpack.c.bf16 %v547_v15, %v546_v19  ;;  %v534_v30 = vmax.f32 %v486_v16, 0.0 }
 0x102   :  { %v552_v40 = vadd.f32 %v1265_v34, %v536_v35 }
 0x103   :  { %v537_v31 = vmax.f32 %v489_v24, 0.0  ;;  %v487_v32 = vadd.f32 %v1722_v53, %v464_v25  ;;  %1378 = vmatprep.mubr.bf16.mxu1 %v558_v29  ;;  %v550_v37 = vadd.f32 %v1261_v26, %v534_v30 }
 0x104   :  { %1379 = vmatmul.mubr.bf16.gmra.mxu1 %v559_v33 }
 0x105   :  { %v535_v36 = vmax.f32 %v487_v32, 0.0  ;;  %v553_v38 = vadd.f32 %v1266_v27, %v537_v31 }
 0x107   :  { %v551_v39 = vadd.f32 %v1262_v28, %v535_v36  ;;  %v561_v42 = vpack.c.bf16 %v553_v38, %v552_v40 }
 0x109   :  { %v560_v41 = vpack.c.bf16 %v551_v39, %v550_v37  ;;  %v1461_v39 = vld [vmem:[%s1995_s10 + $0x38] sm:$0xff]  }
 0x10a   :  { %1386 = vmatprep.subr.bf16.mxu0 %v1461_v39  ;;  %1418 = vmatprep.subr.bf16.mxu1 %v1461_v39 }
 0x10b   :  { %1382 = vmatprep.mubr.bf16.mxu1 %v560_v41  ;;  %1387 = vmatpush3.bf16.msra.mxu0 %v1461_v39 }
 0x10c   :  { %1383 = vmatmul.mubr.bf16.gmra.mxu1 %v561_v42 }
 0x10d   :  { %1426 = vmatpush3.bf16.msra.mxu1 %v1461_v39 }
 0x1b4   :  { %v1769_v53 = vpop.f32.mrf.mxu1 }
 0x1b5   :  { %v732_v44 = vadd.f32 %v1769_v53, %v1767_v43 }
 0x1b6   :  { %v1773_v45 = vpop.f32.mrf.mxu1 }
 0x1b7   :  { %v748_v47 = vmax.f32 %v732_v44, 0.0  ;;  %v730_v48 = vadd.f32 %v1767_v43, %v1773_v45  ;;  %v1462_v44 = vld [vmem:[%s1995_s10 + $0x30] sm:$0xff]  }
 0x1b8   :  { %v1782_v49 = vpop.f32.mrf.mxu1  ;;  %1388 = vmatprep.subr.bf16.mxu0 %v1462_v44  ;;  %1419 = vmatprep.subr.bf16.mxu1 %v1462_v44 }
 0x1b9   :  { %v746_v50 = vmax.f32 %v730_v48, 0.0  ;;  %v733_v51 = vadd.f32 %v1782_v49, %v1767_v43  ;;  %v771_v52 = vmul.f32 %v1778_v46, %v748_v47  ;;  %1389 = vmatpush3.bf16.msra.mxu0 %v1462_v44  ;;  %1427 = vmatpush3.bf16.msra.mxu1 %v1462_v44 }
 0x1ba   :  { %v1787_v54 = vpop.f32.mrf.mxu1 }
 0x1bb   :  { %v749_v55 = vmax.f32 %v733_v51, 0.0  ;;  %v731_v56 = vadd.f32 %v1767_v43, %v1787_v54  ;;  %789 = vadd.xlane.f32.xlu1 %v771_v52  ;;  %v769_v57 = vmul.f32 %v1778_v46, %v746_v50  ;;  %v1464_v51 = vld [vmem:[%s1995_s10 + $0x20] sm:$0xff]   ;;  %v1465_v52 = vld [vmem:[%s1995_s10 + $0x18] sm:$0xff]  }
 0x1bc   :  { %v1792_v58 = vpop.f32.mrf.mxu1 }
 0x1bd   :  { %v747_v59 = vmax.f32 %v731_v56, 0.0  ;;  %v736_v60 = vadd.f32 %v1792_v58, %v1767_v43  ;;  %785 = vadd.xlane.f32.xlu0 %v769_v57  ;;  %v772_v0 = vmul.f32 %v1778_v46, %v749_v55  ;;  %v1467_v55 = vld [vmem:[%s1995_s10 + $0x8] sm:$0xff]   ;;  %v1468_v56 = vld [vmem:[%s1995_s10] sm:$0xff]   ;;  %v1881_v57 = vstv %s1996_s8 }
 0x1be   :  { %v1796_v61 = vpop.f32.mrf.mxu1 }
 0x1bf   :  { %v752_v62 = vmax.f32 %v736_v60, 0.0  ;;  %v734_v63 = vadd.f32 %v1767_v43, %v1796_v61  ;;  %v770_v1 = vmul.f32 %v1778_v46, %v747_v59 }
 0x1c0   :  { %v1802_v2 = vpop.f32.mrf.mxu1 }
 0x1c1   :  { %791 = vadd.xlane.f32.xlu0 %v772_v0  ;;  %787 = vadd.xlane.f32.xlu1 %v770_v1  ;;  %v750_v4 = vmax.f32 %v734_v63, 0.0  ;;  %v775_v7 = vmul.f32 %v1778_v46, %v752_v62  ;;  %v737_v24 = vadd.f32 %v1802_v2, %v1767_v43 }
 0x1c2   :  { %v1804_v3 = vpop.f32.mrf.mxu1 }
 0x1c3   :  { %v735_v6 = vadd.f32 %v1767_v43, %v1804_v3  ;;  %v773_v13 = vmul.f32 %v1778_v46, %v750_v4  ;;  %v753_v32 = vmax.f32 %v737_v24, 0.0 }
 0x1c4   :  { %v1809_v8 = vpop.f32.mrf.mxu1 }
 0x1c5   :  { %v751_v9 = vmax.f32 %v735_v6, 0.0  ;;  %v740_v10 = vadd.f32 %v1809_v8, %v1767_v43  ;;  %797 = vadd.xlane.f32.xlu1 %v775_v7  ;;  %v776_v41 = vmul.f32 %v1778_v46, %v753_v32 }
 0x1c6   :  { %v1813_v11 = vpop.f32.mrf.mxu1 }
 0x1c7   :  { %v756_v12 = vmax.f32 %v740_v10, 0.0  ;;  %v738_v5 = vadd.f32 %v1767_v43, %v1813_v11  ;;  %v774_v14 = vmul.f32 %v1778_v46, %v751_v9 }
 0x1c8   :  { %v1819_v15 = vpop.f32.mrf.mxu1 }
 0x1c9   :  { %v754_v16 = vmax.f32 %v738_v5, 0.0  ;;  %v741_v17 = vadd.f32 %v1819_v15, %v1767_v43  ;;  %793 = vadd.xlane.f32.xlu1 %v773_v13  ;;  %795 = vadd.xlane.f32.xlu0 %v774_v14  ;;  %v779_v21 = vmul.f32 %v1778_v46, %v756_v12 }
 0x1ca   :  { %v1823_v18 = vpop.f32.mrf.mxu1 }
 0x1cb   :  { %v757_v19 = vmax.f32 %v741_v17, 0.0  ;;  %v739_v20 = vadd.f32 %v1767_v43, %v1823_v18  ;;  %v777_v22 = vmul.f32 %v1778_v46, %v754_v16 }
 0x1cc   :  { %v1829_v23 = vpop.f32.mrf.mxu1 }
 0x1cd   :  { %805 = vadd.xlane.f32.xlu1 %v779_v21  ;;  %801 = vadd.xlane.f32.xlu0 %v777_v22  ;;  %v755_v26 = vmax.f32 %v739_v20, 0.0  ;;  %v744_v27 = vadd.f32 %v1829_v23, %v1767_v43  ;;  %v780_v29 = vmul.f32 %v1778_v46, %v757_v19 }
 0x1ce   :  { %v1833_v25 = vpop.f32.mrf.mxu1 }
 0x1cf   :  { %v742_v28 = vadd.f32 %v1767_v43, %v1833_v25  ;;  %v760_v34 = vmax.f32 %v744_v27, 0.0  ;;  %v778_v36 = vmul.f32 %v1778_v46, %v755_v26 }
 0x1d0   :  { %v1840_v30 = vpop.f32.mrf.mxu1 }
 0x1d1   :  { %v758_v31 = vmax.f32 %v742_v28, 0.0  ;;  %807 = vadd.xlane.f32.xlu0 %v780_v29  ;;  %v745_v40 = vadd.f32 %v1840_v30, %v1767_v43  ;;  %v783_v42 = vmul.f32 %v1778_v46, %v760_v34 }
 0x1d2   :  { %v1842_v33 = vpop.f32.mrf.mxu1 }
 0x1d3   :  { %v743_v35 = vadd.f32 %v1767_v43, %v1842_v33  ;;  %v781_v37 = vmul.f32 %v1778_v46, %v758_v31  ;;  %v761_v47 = vmax.f32 %v745_v40, 0.0  ;;  %v1463_v43 = vld [vmem:[%s1995_s10 + $0x28] sm:$0xff]  }
 0x1d4   :  { %1390 = vmatprep.subr.bf16.mxu0 %v1463_v43  ;;  %1420 = vmatprep.subr.bf16.mxu1 %v1463_v43 }
 0x1d5   :  { %v759_v38 = vmax.f32 %v743_v35, 0.0  ;;  %803 = vadd.xlane.f32.xlu0 %v778_v36  ;;  %809 = vadd.xlane.f32.xlu1 %v781_v37  ;;  %v784_v50 = vmul.f32 %v1778_v46, %v761_v47 }
 0x1d6   :  { %1391 = vmatpush3.bf16.msra.mxu0 %v1463_v43  ;;  %1428 = vmatpush3.bf16.msra.mxu1 %v1463_v43 }
 0x1d7   :  { %v782_v48 = vmul.f32 %v1778_v46, %v759_v38  ;;  %1392 = vmatprep.subr.bf16.mxu0 %v1464_v51  ;;  %1421 = vmatprep.subr.bf16.mxu1 %v1464_v51  ;;  %v1466_v46 = vld [vmem:[%s1995_s10 + $0x10] sm:$0xff]  }
 0x1d9   :  { %799 = vadd.xlane.f32.xlu0 %v776_v41  ;;  %813 = vadd.xlane.f32.xlu1 %v783_v42 }
 0x1da   :  { %1393 = vmatpush3.bf16.msra.mxu0 %v1464_v51  ;;  %1429 = vmatpush3.bf16.msra.mxu1 %v1464_v51 }
 0x1db   :  { %1394 = vmatprep.subr.bf16.mxu0 %v1465_v52  ;;  %1422 = vmatprep.subr.bf16.mxu1 %v1465_v52 }
 0x1dd   :  { %811 = vadd.xlane.f32.xlu0 %v782_v48 }
 0x1de   :  { %1395 = vmatpush3.bf16.msra.mxu0 %v1465_v52  ;;  %1430 = vmatpush3.bf16.msra.mxu1 %v1465_v52 }
 0x1df   :  { %1396 = vmatprep.subr.bf16.mxu0 %v1466_v46  ;;  %1423 = vmatprep.subr.bf16.mxu1 %v1466_v46 }
 0x1e1   :  { %815 = vadd.xlane.f32.xlu0 %v784_v50 }
 0x1e2   :  { %1397 = vmatpush3.bf16.msra.mxu0 %v1466_v46  ;;  %1431 = vmatpush3.bf16.msra.mxu1 %v1466_v46 }
 0x1e3   :  { %1398 = vmatprep.subr.bf16.mxu0 %v1467_v55  ;;  %1424 = vmatprep.subr.bf16.mxu1 %v1467_v55 }
 0x1e6   :  { %1399 = vmatpush3.bf16.msra.mxu0 %v1467_v55  ;;  %1432 = vmatpush3.bf16.msra.mxu1 %v1467_v55 }
 0x1e7   :  { %1400 = vmatprep.subr.bf16.mxu0 %v1468_v56  ;;  %1425 = vmatprep.subr.bf16.mxu1 %v1468_v56 }
 0x1ea   :  { %1401 = vmatpush3.bf16.msra.mxu0 %v1468_v56  ;;  %1433 = vmatpush3.bf16.msra.mxu1 %v1468_v56 }
 0x244   :  { %v790_v59 = vpop.xlane.xlu1 %789 }
 0x245   :  { %v821_v60 = vadd.f32 %v1881_v57, %v790_v59 }
 0x246   :  { %v786_v62 = vpop.xlane.xlu0 %785 }
 0x247   :  { %v1211_v63 = vmul.f32 -1.442695, %v821_v60  ;;  %v819_v0 = vadd.f32 %v1881_v57, %v786_v62 }
 0x249   :  { %1469 = vpow2.f32 %v1211_v63  ;;  %v1209_v1 = vmul.f32 -1.442695, %v819_v0 }
 0x24a   :  { %v792_v4 = vpop.xlane.xlu0 %791  ;;  %v788_v6 = vpop.xlane.xlu1 %787 }
 0x24b   :  { %1471 = vpow2.f32 %v1209_v1  ;;  %v822_v7 = vadd.f32 %v1881_v57, %v792_v4  ;;  %v820_v9 = vadd.f32 %v1881_v57, %v788_v6 }
 0x24d   :  { %v1212_v10 = vmul.f32 -1.442695, %v822_v7  ;;  %v1210_v12 = vmul.f32 -1.442695, %v820_v9 }
 0x24e   :  { %v798_v5 = vpop.xlane.xlu1 %797 }
 0x24f   :  { %1473 = vpow2.f32 %v1212_v10  ;;  %v825_v22 = vadd.f32 %v1881_v57, %v798_v5 }
 0x250   :  { %1475 = vpow2.f32 %v1210_v12 }
 0x251   :  { %v1215_v36 = vmul.f32 -1.442695, %v825_v22 }
 0x252   :  { %v794_v13 = vpop.xlane.xlu1 %793  ;;  %v796_v14 = vpop.xlane.xlu0 %795 }
 0x253   :  { %v823_v16 = vadd.f32 %v1881_v57, %v794_v13  ;;  %v824_v17 = vadd.f32 %v1881_v57, %v796_v14 }
 0x255   :  { %v1213_v19 = vmul.f32 -1.442695, %v823_v16  ;;  %v1214_v20 = vmul.f32 -1.442695, %v824_v17 }
 0x256   :  { %v1470_v21 = vpop.eup %1469  ;;  %v806_v24 = vpop.xlane.xlu1 %805 }
 0x257   :  { %v802_v26 = vpop.xlane.xlu0 %801  ;;  %v885_v27 = vadd.f32 1.0, %v1470_v21  ;;  %1477 = vpow2.f32 %v1213_v19  ;;  %v829_v28 = vadd.f32 %v1881_v57, %v806_v24 }
 0x258   :  { %v827_v29 = vadd.f32 %v1881_v57, %v802_v26  ;;  %v1472_v31 = vpop.eup %1471  ;;  %1479 = vpow2.f32 %v1214_v20  ;;  %v1903_v20 = vld [vmem:[%s1997_s9] ss:$0 sm:$0xff] }
 0x259   :  { %1481 = vrcp.f32 %v885_v27  ;;  %v883_v32 = vadd.f32 1.0, %v1472_v31  ;;  %v1219_v34 = vmul.f32 -1.442695, %v829_v28 }
 0x25a   :  { %v1217_v35 = vmul.f32 -1.442695, %v827_v29 }
 0x25b   :  { %v808_v37 = vpop.xlane.xlu0 %807  ;;  %1483 = vrcp.f32 %v883_v32 }
 0x25c   :  { %v830_v38 = vadd.f32 %v1881_v57, %v808_v37  ;;  %v1474_v39 = vpop.eup %1473  ;;  %1485 = vpow2.f32 %v1219_v34 }
 0x25d   :  { %v1476_v40 = vpop.eup %1475  ;;  %v886_v41 = vadd.f32 1.0, %v1474_v39  ;;  %1487 = vpow2.f32 %v1217_v35 }
 0x25e   :  { %v1220_v42 = vmul.f32 -1.442695, %v830_v38  ;;  %v884_v44 = vadd.f32 1.0, %v1476_v40  ;;  %1489 = vpow2.f32 %v1215_v36  ;;  %v810_v48 = vpop.xlane.xlu1 %809 }
 0x25f   :  { %v804_v47 = vpop.xlane.xlu0 %803  ;;  %1491 = vrcp.f32 %v886_v41  ;;  %v831_v50 = vadd.f32 %v1881_v57, %v810_v48 }
 0x260   :  { %v828_v43 = vadd.f32 %v1881_v57, %v804_v47  ;;  %1493 = vrcp.f32 %v884_v44 }
 0x261   :  { %1495 = vpow2.f32 %v1220_v42  ;;  %v1221_v52 = vmul.f32 -1.442695, %v831_v50 }
 0x262   :  { %v1218_v51 = vmul.f32 -1.442695, %v828_v43  ;;  %v814_v55 = vpop.xlane.xlu1 %813 }
 0x263   :  { %v800_v46 = vpop.xlane.xlu0 %799  ;;  %v833_v59 = vadd.f32 %v1881_v57, %v814_v55 }
 0x264   :  { %v826_v56 = vadd.f32 %v1881_v57, %v800_v46  ;;  %v1478_v60 = vpop.eup %1477  ;;  %1497 = vpow2.f32 %v1218_v51 }
 0x265   :  { %v1480_v62 = vpop.eup %1479  ;;  %v887_v63 = vadd.f32 1.0, %v1478_v60  ;;  %1499 = vpow2.f32 %v1221_v52  ;;  %v1223_v6 = vmul.f32 -1.442695, %v833_v59 }
 0x266   :  { %v1216_v0 = vmul.f32 -1.442695, %v826_v56  ;;  %v1482_v1 = vpop.eup %1481  ;;  %v888_v4 = vadd.f32 1.0, %v1480_v62 }
 0x267   :  { %v812_v7 = vpop.xlane.xlu0 %811  ;;  %1501 = vrcp.f32 %v887_v63  ;;  %v933_v13 = vmul.f32 %v1482_v1, %v1769_v53 }
 0x268   :  { %v832_v9 = vadd.f32 %v1881_v57, %v812_v7  ;;  %v1484_v10 = vpop.eup %1483  ;;  %1503 = vrcp.f32 %v888_v4 }
 0x269   :  { %v1486_v12 = vpop.eup %1485  ;;  %1505 = vpow2.f32 %v1216_v0  ;;  %v931_v19 = vmul.f32 %v1484_v10, %v1773_v45  ;;  %v956_v29 = vadd.f32 %v1903_v20, %v933_v13 }
 0x26a   :  { %v1222_v5 = vmul.f32 -1.442695, %v832_v9  ;;  %v1488_v14 = vpop.eup %1487  ;;  %v893_v16 = vadd.f32 1.0, %v1486_v12  ;;  %1507 = vpow2.f32 %v1223_v6 }
 0x26b   :  { %v816_v17 = vpop.xlane.xlu0 %815  ;;  %v1490_v21 = vpop.eup %1489  ;;  %v891_v22 = vadd.f32 1.0, %v1488_v14  ;;  %v954_v32 = vadd.f32 %v1903_v20, %v931_v19  ;;  %v972_v38 = vmax.f32 %v956_v29, 0.0 }
 0x26c   :  { %1509 = vpow2.f32 %v1222_v5  ;;  %v834_v24 = vadd.f32 %v1881_v57, %v816_v17  ;;  %v1492_v26 = vpop.eup %1491  ;;  %v889_v34 = vadd.f32 1.0, %v1490_v21 }
 0x26d   :  { %v1494_v27 = vpop.eup %1493  ;;  %1511 = vrcp.f32 %v893_v16  ;;  %v934_v28 = vmul.f32 %v1492_v26, %v1782_v49  ;;  %v970_v41 = vmax.f32 %v954_v32, 0.0 }
 0x26e   :  { %v1224_v53 = vmul.f32 -1.442695, %v834_v24  ;;  %v1496_v31 = vpop.eup %1495  ;;  %1513 = vrcp.f32 %v891_v22  ;;  %v932_v45 = vmul.f32 %v1494_v27, %v1787_v54 }
 0x26f   :  { %v894_v35 = vadd.f32 1.0, %v1496_v31  ;;  %v957_v36 = vadd.f32 %v1903_v20, %v934_v28 }
 0x270   :  { %1515 = vpow2.f32 %v1224_v53  ;;  %v955_v57 = vadd.f32 %v1903_v20, %v932_v45 }
 0x271   :  { %v1498_v37 = vpop.eup %1497  ;;  %1517 = vrcp.f32 %v894_v35  ;;  %v973_v39 = vmax.f32 %v957_v36, 0.0 }
 0x272   :  { %v1500_v49 = vpop.eup %1499  ;;  %v892_v40 = vadd.f32 1.0, %v1498_v37  ;;  %v971_v42 = vmax.f32 %v955_v57, 0.0  ;;  %1519 = vrcp.f32 %v889_v34 }
 0x273   :  { %v895_v44 = vadd.f32 1.0, %v1500_v49  ;;  %v987_v54 = vpack.c.bf16 %v973_v39, %v972_v38 }
 0x274   :  { %v1502_v47 = vpop.eup %1501  ;;  %1521 = vrcp.f32 %v892_v40  ;;  %v986_v48 = vpack.c.bf16 %v971_v42, %v970_v41 }
 0x275   :  { %v1504_v43 = vpop.eup %1503  ;;  %1523 = vrcp.f32 %v895_v44  ;;  %v935_v50 = vmul.f32 %v1502_v47, %v1796_v61 }
 0x276   :  { %v1506_v51 = vpop.eup %1505  ;;  %1402 = vmatprep.mubr.bf16.mxu0 %v986_v48  ;;  %v936_v52 = vmul.f32 %v1504_v43, %v1804_v3  ;;  %v1226_v48 = vld [vmem:[%s1998_s11] ss:$0 sm:$0xff] }
 0x277   :  { %v1508_v46 = vpop.eup %1507  ;;  %v890_v55 = vadd.f32 1.0, %v1506_v51  ;;  %1403 = vmatmul.mubr.bf16.vlgmr.msra.gmra.mxu0 %v987_v54  ;;  %v958_v56 = vadd.f32 %v1903_v20, %v935_v50 }
 0x278   :  { %v897_v60 = vadd.f32 1.0, %v1508_v46  ;;  %v959_v62 = vadd.f32 %v1903_v20, %v936_v52 }
 0x279   :  { %v1510_v59 = vpop.eup %1509  ;;  %1525 = vrcp.f32 %v890_v55  ;;  %v974_v0 = vmax.f32 %v958_v56, 0.0 }
 0x27a   :  { %v896_v63 = vadd.f32 1.0, %v1510_v59  ;;  %v1512_v1 = vpop.eup %1511  ;;  %1527 = vrcp.f32 %v897_v60  ;;  %v975_v4 = vmax.f32 %v959_v62, 0.0 }
 0x27b   :  { %v1514_v61 = vpop.eup %1513  ;;  %v941_v12 = vmul.f32 %v1512_v1, %v1809_v8 }
 0x27c   :  { %1529 = vrcp.f32 %v896_v63  ;;  %v988_v7 = vpack.c.bf16 %v975_v4, %v974_v0  ;;  %v939_v10 = vmul.f32 %v1514_v61, %v1813_v11 }
 0x27d   :  { %v1516_v6 = vpop.eup %1515  ;;  %v964_v22 = vadd.f32 %v1903_v20, %v941_v12 }
 0x27e   :  { %v898_v3 = vadd.f32 1.0, %v1516_v6  ;;  %v1518_v9 = vpop.eup %1517  ;;  %1406 = vmatprep.mubr.bf16.mxu0 %v988_v7  ;;  %v962_v21 = vadd.f32 %v1903_v20, %v939_v10 }
 0x27f   :  { %v942_v5 = vmul.f32 %v1518_v9, %v1819_v15  ;;  %v1520_v13 = vpop.eup %1519  ;;  %v980_v29 = vmax.f32 %v964_v22, 0.0 }
 0x280   :  { %1531 = vrcp.f32 %v898_v3  ;;  %v937_v24 = vmul.f32 %v1520_v13, %v1792_v58  ;;  %v978_v15 = vmax.f32 %v962_v21, 0.0 }
 0x281   :  { %v1522_v14 = vpop.eup %1521  ;;  %v965_v16 = vadd.f32 %v1903_v20, %v942_v5 }
 0x282   :  { %v1524_v17 = vpop.eup %1523  ;;  %v940_v19 = vmul.f32 %v1522_v14, %v1823_v18  ;;  %v960_v18 = vadd.f32 %v1903_v20, %v937_v24 }
 0x283   :  { %v943_v26 = vmul.f32 %v1524_v17, %v1833_v25  ;;  %v981_v8 = vmax.f32 %v965_v16, 0.0 }
 0x284   :  { %v963_v11 = vadd.f32 %v1903_v20, %v940_v19  ;;  %v976_v57 = vmax.f32 %v960_v18, 0.0 }
 0x285   :  { %v966_v34 = vadd.f32 %v1903_v20, %v943_v26  ;;  %v991_v35 = vpack.c.bf16 %v981_v8, %v980_v29 }
 0x286   :  { %v1526_v27 = vpop.eup %1525  ;;  %v979_v53 = vmax.f32 %v963_v11, 0.0 }
 0x287   :  { %v1528_v28 = vpop.eup %1527  ;;  %v938_v31 = vmul.f32 %v1526_v27, %v1802_v2  ;;  %v982_v39 = vmax.f32 %v966_v34, 0.0 }
 0x288   :  { %v990_v32 = vpack.c.bf16 %v979_v53, %v978_v15  ;;  %v945_v25 = vmul.f32 %v1528_v28, %v1829_v23 }
 0x289   :  { %v1530_v45 = vpop.eup %1529  ;;  %v961_v58 = vadd.f32 %v1903_v20, %v938_v31 }
 0x28a   :  { %v944_v36 = vmul.f32 %v1530_v45, %v1842_v33  ;;  %1410 = vmatprep.mubr.bf16.mxu1 %v990_v32  ;;  %v968_v42 = vadd.f32 %v1903_v20, %v945_v25 }
 0x28b   :  { %1411 = vmatmul.mubr.bf16.vlgmr.msra.gmra.mxu1 %v991_v35  ;;  %v977_v37 = vmax.f32 %v961_v58, 0.0 }
 0x28c   :  { %v967_v38 = vadd.f32 %v1903_v20, %v944_v36  ;;  %v984_v23 = vmax.f32 %v968_v42, 0.0 }
 0x28d   :  { %v1532_v2 = vpop.eup %1531  ;;  %v989_v49 = vpack.c.bf16 %v977_v37, %v976_v57 }
 0x28e   :  { %v983_v40 = vmax.f32 %v967_v38, 0.0  ;;  %v946_v41 = vmul.f32 %v1532_v2, %v1840_v30 }
 0x28f   :  { %1407 = vmatmul.mubr.bf16.gmra.mxu0 %v989_v49 }
 0x290   :  { %v992_v44 = vpack.c.bf16 %v983_v40, %v982_v39  ;;  %v969_v33 = vadd.f32 %v1903_v20, %v946_v41 }
 0x292   :  { %1414 = vmatprep.mubr.bf16.mxu1 %v992_v44  ;;  %v985_v54 = vmax.f32 %v969_v33, 0.0 }
 0x294   :  { %v993_v47 = vpack.c.bf16 %v985_v54, %v984_v23 }
 0x296   :  { %1415 = vmatmul.mubr.bf16.gmra.mxu1 %v993_v47 }
 0x337   :  { %v1404_v43 = vpop.f32.mrf.mxu0 }
 0x338   :  { %v1108_v50 = vadd.f32 %v1404_v43, %v1226_v48 }
 0x339   :  { %v1099_v51 = vpop.f32.mrf.mxu0 }
 0x33a   :  { %1164 = vst [vmem:[%s1999_s12 + $0x10] sm:$0xff] %v1108_v50  ;;  %v1100_v30 = vadd.f32 %v1226_v48, %v1099_v51 }
 0x33b   :  { %v1405_v52 = vpop.f32.mrf.mxu0 }
 0x33c   :  { %1162 = vst [vmem:[%s1999_s12] sm:$0xff] %v1100_v30  ;;  %v1111_v20 = vadd.f32 %v1405_v52, %v1226_v48 }
 0x33d   :  { %v1102_v46 = vpop.f32.mrf.mxu0 }
 0x33e   :  { %1165 = vst [vmem:[%s1999_s12 + $0x18] sm:$0xff] %v1111_v20  ;;  %v1103_v55 = vadd.f32 %v1226_v48, %v1102_v46 }
 0x340   :  { %1163 = vst [vmem:[%s1999_s12 + $0x8] sm:$0xff] %v1103_v55 }
 0x34b   :  { %v1412_v56 = vpop.f32.mrf.mxu1 }
 0x34c   :  { %v1140_v59 = vadd.f32 %v1412_v56, %v1226_v48 }
 0x34d   :  { %v1131_v60 = vpop.f32.mrf.mxu1 }
 0x34e   :  { %1172 = vst [vmem:[%s1999_s12 + $0x50] sm:$0xff] %v1140_v59  ;;  %v1132_v62 = vadd.f32 %v1226_v48, %v1131_v60 }
 0x34f   :  { %v1408_v63 = vpop.f32.mrf.mxu0  ;;  %v1413_v0 = vpop.f32.mrf.mxu1 }
 0x350   :  { %1170 = vst [vmem:[%s1999_s12 + $0x40] sm:$0xff] %v1132_v62  ;;  %v1124_v1 = vadd.f32 %v1408_v63, %v1226_v48  ;;  %v1143_v4 = vadd.f32 %v1413_v0, %v1226_v48 }
 0x351   :  { %v1115_v61 = vpop.f32.mrf.mxu0  ;;  %v1134_v6 = vpop.f32.mrf.mxu1 }
 0x352   :  { %1168 = vst [vmem:[%s1999_s12 + $0x30] sm:$0xff] %v1124_v1  ;;  %1173 = vst [vmem:[%s1999_s12 + $0x58] sm:$0xff] %v1143_v4  ;;  %v1116_v7 = vadd.f32 %v1226_v48, %v1115_v61  ;;  %v1135_v3 = vadd.f32 %v1226_v48, %v1134_v6 }
 0x353   :  { %v1409_v9 = vpop.f32.mrf.mxu0 }
 0x354   :  { %1166 = vst [vmem:[%s1999_s12 + $0x20] sm:$0xff] %v1116_v7  ;;  %1171 = vst [vmem:[%s1999_s12 + $0x48] sm:$0xff] %v1135_v3  ;;  %v1127_v10 = vadd.f32 %v1409_v9, %v1226_v48 }
 0x355   :  { %v1118_v12 = vpop.f32.mrf.mxu0 }
 0x356   :  { %v1416_v5 = vpop.f32.mrf.mxu1  ;;  %1169 = vst [vmem:[%s1999_s12 + $0x38] sm:$0xff] %v1127_v10  ;;  %v1119_v13 = vadd.f32 %v1226_v48, %v1118_v12 }
 0x357   :  { %v1156_v14 = vadd.f32 %v1416_v5, %v1226_v48 }
 0x358   :  { %v1147_v16 = vpop.f32.mrf.mxu1  ;;  %1167 = vst [vmem:[%s1999_s12 + $0x28] sm:$0xff] %v1119_v13 }
 0x359   :  { %1176 = vst [vmem:[%s1999_s12 + $0x70] sm:$0xff] %v1156_v14  ;;  %v1148_v17 = vadd.f32 %v1226_v48, %v1147_v16 }
 0x35a   :  { %v1417_v19 = vpop.f32.mrf.mxu1 }
 0x35b   :  { %1174 = vst [vmem:[%s1999_s12 + $0x60] sm:$0xff] %v1148_v17  ;;  %v1159_v21 = vadd.f32 %v1417_v19, %v1226_v48 }
 0x35c   :  { %v1150_v22 = vpop.f32.mrf.mxu1 }
 0x35d   :  { %1177 = vst [vmem:[%s1999_s12 + $0x78] sm:$0xff] %v1159_v21  ;;  %v1151_v24 = vadd.f32 %v1226_v48, %v1150_v22 }
 0x35f   :  { %1175 = vst [vmem:[%s1999_s12 + $0x68] sm:$0xff] %v1151_v24 }

</bundles_post_ra>
